<compile_context>
chip_gen: v7x
topology: tpu7x:2x2x1
jax: 0.10.0
libtpu: 0.0.40
codegen_flags: <defaults>
</compile_context>

<pallas_src>
import functools

import jax
import jax.numpy as jnp
from jax.experimental import pallas as pl
from jax.experimental.pallas import tpu as pltpu

LN_EPS = 1e-5  # torch.nn.LayerNorm default eps


# ----------------------------------------------------------------------------
# small helpers
# ----------------------------------------------------------------------------
def _round_up(x, m):
    return (x + m - 1) // m * m


def _cdiv(a, b):
    return (a + b - 1) // b


def _pad2(x, r, c):
    return jnp.pad(x, ((0, r - x.shape[0]), (0, c - x.shape[1])))


def _pad3(x, t, c):
    return jnp.pad(x, ((0, 0), (0, t - x.shape[1]), (0, c - x.shape[2])))


def _pad_last(x, c):
    pad = [(0, 0)] * (x.ndim - 1) + [(0, c - x.shape[-1])]
    return jnp.pad(x, pad)


def _select_config():
    """Generation-aware VMEM limit and tile caps.

    v5e/v6e have 128 MiB VMEM per (single) TensorCore; v7x has 64 MiB per TC
    and 2 TCs per chip.  Unknown -> conservative (v7x-like) settings.
    """
    vmem = None
    try:
        vmem = getattr(pltpu.get_tpu_info(), "vmem_capacity_bytes", None)
    except Exception:
        vmem = None
    if vmem is not None and vmem > 96 * 1024 * 1024:
        # v5e / v6e
        return dict(vmem_limit=48 << 20, max_t_tile=256, max_row_tile=256,
                    max_v_tile=4096, two_cores=False)
    # v7x (64 MiB / TC, 2 TCs) or unknown generation.
    return dict(vmem_limit=40 << 20, max_t_tile=128, max_row_tile=256,
                max_v_tile=2048, two_cores=vmem is not None)


def _layernorm_f32(y, d_real, lane_keep):
    """Centered LayerNorm statistics over the *real* feature width.

    `y`'s zero-padded lanes are exactly zero (zero-padded weights/biases), so
    the mean over all lanes equals the mean over the real lanes; `lane_keep`
    re-zeroes the padded lanes after centering so the variance is exact too.
    """
    inv_d = 1.0 / float(d_real)
    mu = jnp.sum(y, axis=-1, keepdims=True) * inv_d
    yc = jnp.where(lane_keep, y - mu, 0.0)
    var = jnp.sum(yc * yc, axis=-1, keepdims=True) * inv_d
    return yc * jax.lax.rsqrt(var + LN_EPS)


# ----------------------------------------------------------------------------
# Kernel 1: fused pre-decoder pipeline
#   whisper stand-in linear -> audio Linear/LN/+PE
#   video Linear/LN/+PE
#   reduced gated cross-modal fusion (in-kernel padding masks) + residual
# ----------------------------------------------------------------------------
def fused_prenet_kernel(alen_ref, vlen_ref,                      # SMEM prefetch
                        amel_ref, vfeat_ref, pe_ref,
                        w_wh_ref, b_wh_ref,
                        w_ap_ref, b_ap_ref, g_a_ref, bta_a_ref,
                        w_vp_ref, b_vp_ref, g_v_ref, bta_v_ref,
                        w_ga_ref, w_gv_ref, b_gate_ref,
                        o_ref, *, d_model, t_tile):
    b = pl.program_id(0)
    t = pl.program_id(1)
    d_pad = pe_ref.shape[-1]

    # Padding masks rebuilt in-kernel from scalar-prefetched lengths
    # (replaces two (B, T, 1) HBM mask streams and their masked loads).
    row = t * t_tile + jax.lax.broadcasted_iota(jnp.int32, (t_tile, d_pad), 0)
    a_keep = (row < alen_ref[b]).astype(jnp.float32)
    v_keep = (row < vlen_ref[b]).astype(jnp.float32)
    lane_keep = jax.lax.broadcasted_iota(jnp.int32, (t_tile, d_pad), 1) < d_model

    pe = pe_ref[...].astype(jnp.float32)

    # frozen Whisper-encoder stand-in: one linear projection of the mel features
    wh = jnp.dot(amel_ref[0], w_wh_ref[...],
                 preferred_element_type=jnp.float32) + b_wh_ref[...].astype(jnp.float32)

    # audio branch: Linear -> LayerNorm -> +PE
    ya = jnp.dot(wh.astype(jnp.bfloat16), w_ap_ref[...],
                 preferred_element_type=jnp.float32) + b_ap_ref[...].astype(jnp.float32)
    ya = (_layernorm_f32(ya, d_model, lane_keep) * g_a_ref[...].astype(jnp.float32)
          + bta_a_ref[...].astype(jnp.float32) + pe)

    # video branch: Linear -> LayerNorm -> +PE
    yv = jnp.dot(vfeat_ref[0], w_vp_ref[...],
                 preferred_element_type=jnp.float32) + b_vp_ref[...].astype(jnp.float32)
    yv = (_layernorm_f32(yv, d_model, lane_keep) * g_v_ref[...].astype(jnp.float32)
          + bta_v_ref[...].astype(jnp.float32) + pe)

    # reduced gated fusion on padding-masked features; two K=d MXU passes
    # (no (t_tile, 2*d) concat buffer in VMEM).
    a_in = ya * a_keep
    v_in = yv * v_keep
    gate = jax.nn.sigmoid(
        jnp.dot(a_in.astype(jnp.bfloat16), w_ga_ref[...],
                preferred_element_type=jnp.float32)
        + jnp.dot(v_in.astype(jnp.bfloat16), w_gv_ref[...],
                  preferred_element_type=jnp.float32)
        + b_gate_ref[...].astype(jnp.float32))
    fused = gate * a_in + (1.0 - gate) * v_in

    # residual `fused + audio + video` (unmasked), as in AVNet.forward
    o_ref[0] = (fused + ya + yv).astype(o_ref.dtype)


def fused_prenet(a_len, v_len, amel, vfeat, pe, pp, d_model, t_tile,
                 vmem_limit, single_buffer_consts):
    B, T_pad, nm_pad = amel.shape
    dv_pad = vfeat.shape[2]
    d_pad = pe.shape[1]
    dw_pad = pp["w_whisper"].shape[1]
    n_t = T_pad // t_tile

    kern = functools.partial(fused_prenet_kernel, d_model=d_model, t_tile=t_tile)

    def row_spec(last):
        return pl.BlockSpec((1, t_tile, last), lambda b, t, al, vl: (b, t, 0))

    def const_spec(shape):
        idx = lambda b, t, al, vl: (0, 0)
        if single_buffer_consts:
            # Constant-index weights/biases never change across the grid:
            # single-buffer them so they are not double-buffered in VMEM.
            return pl.BlockSpec(shape, idx, pipeline_mode=pl.Buffered(1))
        return pl.BlockSpec(shape, idx)

    return pl.pallas_call(
        kern,
        out_shape=jax.ShapeDtypeStruct((B, T_pad, d_pad), jnp.bfloat16),
        grid_spec=pltpu.PrefetchScalarGridSpec(
            num_scalar_prefetch=2,
            grid=(B, n_t),
            in_specs=[
                row_spec(nm_pad),                                        # audio mels
                row_spec(dv_pad),                                        # video features
                pl.BlockSpec((t_tile, d_pad), lambda b, t, al, vl: (t, 0)),  # PE
                const_spec((nm_pad, dw_pad)), const_spec((1, dw_pad)),   # whisper stand-in
                const_spec((dw_pad, d_pad)), const_spec((1, d_pad)),     # audio proj
                const_spec((1, d_pad)), const_spec((1, d_pad)),          # audio LN
                const_spec((dv_pad, d_pad)), const_spec((1, d_pad)),     # video proj
                const_spec((1, d_pad)), const_spec((1, d_pad)),          # video LN
                const_spec((d_pad, d_pad)),                              # gate (audio)
                const_spec((d_pad, d_pad)),                              # gate (video)
                const_spec((1, d_pad)),                                  # gate bias
            ],
            out_specs=pl.BlockSpec((1, t_tile, d_pad),
                                   lambda b, t, al, vl: (b, t, 0)),
        ),
        compiler_params=pltpu.CompilerParams(
            dimension_semantics=("parallel", "parallel"),
            vmem_limit_bytes=vmem_limit),
    )(a_len, v_len, amel, vfeat, pe,
      pp["w_whisper"], pp["b_whisper"],
      pp["w_aproj"], pp["b_aproj"], pp["g_aln"], pp["b_aln"],
      pp["w_vproj"], pp["b_vproj"], pp["g_vln"], pp["b_vln"],
      pp["w_gate_a"], pp["w_gate_v"], pp["b_gate"])


# ----------------------------------------------------------------------------
# Kernel 2: decoder output head, logits = x @ Wv + bv, tiled over (vocab, rows)
# ----------------------------------------------------------------------------
def decoder_kernel(x_ref, w_ref, b_ref, o_ref):
    # bf16 writeback: the head is writeback-bound on all generations.
    # TODO(synk): fuse the downstream log-softmax / argmax here if needed.
    o_ref[...] = (jnp.dot(x_ref[...], w_ref[...],
                          preferred_element_type=jnp.float32)
                  + b_ref[...].astype(jnp.float32)).astype(o_ref.dtype)


def decoder_head(x, w, b, row_tile, v_tile, vmem_limit, single_buffer_consts):
    n_pad, d_pad = x.shape
    v_pad = w.shape[1]

    def w_spec(shape, idx):
        if single_buffer_consts:
            # The weight block only changes on the (outer) vocab axis; a single
            # buffer halves its VMEM footprint, the rare exposed DMA is
            # amortized over the whole inner row loop.
            return pl.BlockSpec(shape, idx, pipeline_mode=pl.Buffered(1))
        return pl.BlockSpec(shape, idx)

    # vocab tiles outer / row tiles inner: each (d_pad, v_tile) weight block is
    # fetched once per vocab tile and reused across the whole inner row loop.
    return pl.pallas_call(
        decoder_kernel,
        out_shape=jax.ShapeDtypeStruct((n_pad, v_pad), jnp.bfloat16),
        grid=(v_pad // v_tile, n_pad // row_tile),
        in_specs=[
            pl.BlockSpec((row_tile, d_pad), lambda j, i: (i, 0)),
            w_spec((d_pad, v_tile), lambda j, i: (0, j)),
            w_spec((1, v_tile), lambda j, i: (0, j)),
        ],
        out_specs=pl.BlockSpec((row_tile, v_tile), lambda j, i: (i, j)),
        compiler_params=pltpu.CompilerParams(
            dimension_semantics=("parallel", "parallel"),
            vmem_limit_bytes=vmem_limit),
    )(x, w, b)


# ----------------------------------------------------------------------------
# Glue: positional encoding, parameter init, full forward
# ----------------------------------------------------------------------------
def sinusoidal_pe(t, d):
    pos = jnp.arange(t, dtype=jnp.float32)[:, None]
    i = jnp.arange(0, d, 2, dtype=jnp.float32)
    div = jnp.exp(-jnp.log(10000.0) * i / d)
    pe = jnp.zeros((t, d), jnp.float32)
    pe = pe.at[:, 0::2].set(jnp.sin(pos * div))
    pe = pe.at[:, 1::2].set(jnp.cos(pos * div))
    return pe


def init_params(key, n_mels, d_whisper, d_vis, d_model, vocab):
    ks = jax.random.split(key, 10)
    s = 0.05
    return {
        # frozen feature-extractor stand-ins
        "w_whisper": s * jax.random.normal(ks[0], (n_mels, d_whisper), jnp.float32),
        "b_whisper": jnp.zeros((1, d_whisper), jnp.float32),
        # audio_proj / audio_ln
        "w_aproj": s * jax.random.normal(ks[1], (d_whisper, d_model), jnp.float32),
        "b_aproj": jnp.zeros((1, d_model), jnp.float32),
        "g_aln": jnp.ones((1, d_model), jnp.float32),
        "b_aln": jnp.zeros((1, d_model), jnp.float32),
        # video_proj / video_ln   (2048 -> d_model in the original; d_vis here)
        "w_vproj": s * jax.random.normal(ks[2], (d_vis, d_model), jnp.float32),
        "b_vproj": jnp.zeros((1, d_model), jnp.float32),
        "g_vln": jnp.ones((1, d_model), jnp.float32),
        "b_vln": jnp.zeros((1, d_model), jnp.float32),
        # fusion gate
        "w_gate_a": s * jax.random.normal(ks[3], (d_model, d_model), jnp.float32),
        "w_gate_v": s * jax.random.normal(ks[4], (d_model, d_model), jnp.float32),
        "b_gate": jnp.zeros((1, d_model), jnp.float32),
        # decoder head
        "w_dec": s * jax.random.normal(ks[5], (d_model, vocab), jnp.float32),
        "b_dec": jnp.zeros((1, vocab), jnp.float32),
    }


def avnet_forward(params, audioBatch, audioMask, videoBatch, videoMask, videoLen):
    cfg = _select_config()
    B = audioBatch.shape[0]
    d_whisper = params["w_whisper"].shape[1]
    d_model = params["w_aproj"].shape[1]
    vocab = params["w_dec"].shape[1]

    # audioBatch.transpose(1,2) branch only fires for (B, 3000, 80) whisper input.
    if audioBatch.shape[1] == 3000 and audioBatch.shape[2] == 80:
        audioBatch = jnp.swapaxes(audioBatch, 1, 2)
    Ta, n_mels = audioBatch.shape[1], audioBatch.shape[2]
    Tv, d_vis = videoBatch.shape[1], videoBatch.shape[2]

    # TODO(synk): frozen pretrained Whisper encoder replaced by a frozen linear
    #             projection and MoCoVisualFrontend replaced by identity on
    #             pre-extracted per-frame features (no checkpoint loading here).
    T = min(Ta, Tv)
    audioBatch = audioBatch[:, :T]
    videoBatch = videoBatch[:, :T]
    audioMask = audioMask[:, :T]
    videoLen = jnp.minimum(videoLen, T)            # videoLen.clamp_(max=min_len)

    # ---- padded / tiled sizes (lane dims -> multiples of 128, rows -> of 8) ----
    n_t = _cdiv(T, cfg["max_t_tile"])
    t_tile = _round_up(_cdiv(T, n_t), 8)
    T_pad = n_t * t_tile
    nm_pad = _round_up(n_mels, 128)
    dw_pad = _round_up(d_whisper, 128)
    dv_pad = _round_up(d_vis, 128)
    d_pad = _round_up(d_model, 128)

    # ---- inputs: pad + cast matmul operands to bf16 ----
    amel = _pad3(audioBatch, T_pad, nm_pad).astype(jnp.bfloat16)
    vfeat = _pad3(videoBatch, T_pad, dv_pad).astype(jnp.bfloat16)

    # Scalar-prefetched per-batch valid lengths; masks rebuilt in-kernel.
    # TODO(synk): assumes audioMask is a suffix padding mask (True == padded),
    #             matching make_padding_mask; an arbitrary boolean mask would
    #             need a dense-mask input instead.
    a_len = (T - jnp.sum(audioMask.astype(jnp.int32), axis=1)).astype(jnp.int32)
    v_len = videoLen.astype(jnp.int32)

    # PE shared over B, stored bf16 (upcast in-kernel).
    pe = _pad2(sinusoidal_pe(T, d_model), T_pad, d_pad).astype(jnp.bfloat16)

    # ---- parameters: zero-pad to lane multiples; everything bf16 in HBM ----
    pp = {
        "w_whisper": _pad2(params["w_whisper"], nm_pad, dw_pad).astype(jnp.bfloat16),
        "b_whisper": _pad_last(params["b_whisper"], dw_pad).astype(jnp.bfloat16),
        "w_aproj": _pad2(params["w_aproj"], dw_pad, d_pad).astype(jnp.bfloat16),
        "b_aproj": _pad_last(params["b_aproj"], d_pad).astype(jnp.bfloat16),
        "g_aln": _pad_last(params["g_aln"], d_pad).astype(jnp.bfloat16),
        "b_aln": _pad_last(params["b_aln"], d_pad).astype(jnp.bfloat16),
        "w_vproj": _pad2(params["w_vproj"], dv_pad, d_pad).astype(jnp.bfloat16),
        "b_vproj": _pad_last(params["b_vproj"], d_pad).astype(jnp.bfloat16),
        "g_vln": _pad_last(params["g_vln"], d_pad).astype(jnp.bfloat16),
        "b_vln": _pad_last(params["b_vln"], d_pad).astype(jnp.bfloat16),
        "w_gate_a": _pad2(params["w_gate_a"], d_pad, d_pad).astype(jnp.bfloat16),
        "w_gate_v": _pad2(params["w_gate_v"], d_pad, d_pad).astype(jnp.bfloat16),
        "b_gate": _pad_last(params["b_gate"], d_pad).astype(jnp.bfloat16),
    }

    # ---- fused pre-decoder pipeline (single pallas_call) ----
    # TODO(synk): full GatedCrossModalFusion (multi-head cross-attn stack) is
    #             undefined in the snippet; reduced gated fusion implemented.
    def run_prenet(single_buffer):
        return fused_prenet(a_len, v_len, amel, vfeat, pe, pp, d_model, t_tile,
                            cfg["vmem_limit"], single_buffer)
    try:
        out = run_prenet(True)
    except Exception:
        out = run_prenet(False)   # fallback if pl.Buffered(1) is rejected

    # ---- decoder head, tiled over (vocab, rows), bf16 logits ----
    n = B * T_pad
    n_r = _cdiv(n, cfg["max_row_tile"])
    row_tile = _round_up(_cdiv(n, n_r), 8)
    n_pad = n_r * row_tile
    x = jnp.pad(out.reshape(n, d_pad), ((0, n_pad - n), (0, 0)))

    v_pad0 = _round_up(vocab, 128)
    n_v = _cdiv(v_pad0, cfg["max_v_tile"])
    if cfg["two_cores"] and n_v > 1 and n_v % 2 == 1:
        n_v += 1                         # even vocab-tile count keeps both TCs busy
    v_tile = _round_up(_cdiv(v_pad0, n_v), 128)
    v_pad = n_v * v_tile

    w_dec = _pad2(params["w_dec"], d_pad, v_pad).astype(jnp.bfloat16)
    b_dec = _pad_last(params["b_dec"], v_pad).astype(jnp.bfloat16)

    def run_head(single_buffer):
        return decoder_head(x, w_dec, b_dec, row_tile, v_tile,
                            cfg["vmem_limit"], single_buffer)
    try:
        logits = run_head(True)
    except Exception:
        logits = run_head(False)

    logits = logits[:n].reshape(B, T_pad, v_pad)[:, :T, :vocab]
    return logits


if __name__ == "__main__":
    key = jax.random.PRNGKey(0)
    k_in, k_par = jax.random.split(key)

    # small shapes consistent with the forward pass
    B, T = 2, 8
    n_mels = 80        # whisper mel bins
    d_whisper = 64     # stand-in for whisper-small d_model=768
    d_vis = 128        # stand-in for MoCo frontend output dim 2048
    d_model = 32       # modelargs[0]
    vocab = 40

    ks = jax.random.split(k_in, 4)
    audioBatch = jax.random.normal(ks[0], (B, T, n_mels), jnp.float32)
    audioMask = jnp.zeros((B, T), jnp.bool_).at[1, 6:].set(True)   # True = padded
    videoBatch = jax.random.normal(ks[1], (B, T, d_vis), jnp.float32)
    videoMask = jnp.zeros((B, T), jnp.bool_)                        # unused in forward
    videoLen = jnp.array([8, 6], jnp.int32)

    params = init_params(k_par, n_mels, d_whisper, d_vis, d_model, vocab)

    logits = avnet_forward(params, audioBatch, audioMask, videoBatch, videoMask, videoLen)
    logits = jax.block_until_ready(logits)
    assert logits.shape == (B, T, vocab), logits.shape
    assert bool(jnp.all(jnp.isfinite(logits.astype(jnp.float32))))
    print("KERNEL_OK")
</pallas_src>

<mosaic_0001>
module attributes {stable_mosaic.version = 11 : i64} {
  func.func @fused_prenet_kernel(%arg0: i32, %arg1: i32, %arg2: memref<2xi32, #tpu.memory_space<smem>>, %arg3: memref<2xi32, #tpu.memory_space<smem>>, %arg4: memref<1x8x128xbf16, #tpu.memory_space<vmem>>, %arg5: memref<1x8x128xbf16, #tpu.memory_space<vmem>>, %arg6: memref<8x128xbf16, #tpu.memory_space<vmem>>, %arg7: memref<128x128xbf16, #tpu.memory_space<vmem>>, %arg8: memref<1x128xbf16, #tpu.memory_space<vmem>>, %arg9: memref<128x128xbf16, #tpu.memory_space<vmem>>, %arg10: memref<1x128xbf16, #tpu.memory_space<vmem>>, %arg11: memref<1x128xbf16, #tpu.memory_space<vmem>>, %arg12: memref<1x128xbf16, #tpu.memory_space<vmem>>, %arg13: memref<128x128xbf16, #tpu.memory_space<vmem>>, %arg14: memref<1x128xbf16, #tpu.memory_space<vmem>>, %arg15: memref<1x128xbf16, #tpu.memory_space<vmem>>, %arg16: memref<1x128xbf16, #tpu.memory_space<vmem>>, %arg17: memref<128x128xbf16, #tpu.memory_space<vmem>>, %arg18: memref<128x128xbf16, #tpu.memory_space<vmem>>, %arg19: memref<1x128xbf16, #tpu.memory_space<vmem>>, %arg20: memref<1x8x128xbf16, #tpu.memory_space<vmem>>) attributes {dimension_semantics = [#tpu.dimension_semantics<parallel>, #tpu.dimension_semantics<parallel>], iteration_bounds = array<i64: 2, 1>, scalar_prefetch = 2 : i64, scratch_operands = 0 : i64, tpu.core_type = #tpu.core_type<tc>, window_params = [{transform_indices = @transform_0, window_bounds = array<i64: 1, 8, 128>}, {transform_indices = @transform_1, window_bounds = array<i64: 1, 8, 128>}, {transform_indices = @transform_2, window_bounds = array<i64: 8, 128>}, {pipeline_mode = #tpu.pipeline_mode<synchronous>, transform_indices = @transform_3, window_bounds = array<i64: 128, 128>}, {pipeline_mode = #tpu.pipeline_mode<synchronous>, transform_indices = @transform_4, window_bounds = array<i64: 1, 128>}, {pipeline_mode = #tpu.pipeline_mode<synchronous>, transform_indices = @transform_5, window_bounds = array<i64: 128, 128>}, {pipeline_mode = #tpu.pipeline_mode<synchronous>, transform_indices = @transform_6, window_bounds = array<i64: 1, 128>}, {pipeline_mode = #tpu.pipeline_mode<synchronous>, transform_indices = @transform_7, window_bounds = array<i64: 1, 128>}, {pipeline_mode = #tpu.pipeline_mode<synchronous>, transform_indices = @transform_8, window_bounds = array<i64: 1, 128>}, {pipeline_mode = #tpu.pipeline_mode<synchronous>, transform_indices = @transform_9, window_bounds = array<i64: 128, 128>}, {pipeline_mode = #tpu.pipeline_mode<synchronous>, transform_indices = @transform_10, window_bounds = array<i64: 1, 128>}, {pipeline_mode = #tpu.pipeline_mode<synchronous>, transform_indices = @transform_11, window_bounds = array<i64: 1, 128>}, {pipeline_mode = #tpu.pipeline_mode<synchronous>, transform_indices = @transform_12, window_bounds = array<i64: 1, 128>}, {pipeline_mode = #tpu.pipeline_mode<synchronous>, transform_indices = @transform_13, window_bounds = array<i64: 128, 128>}, {pipeline_mode = #tpu.pipeline_mode<synchronous>, transform_indices = @transform_14, window_bounds = array<i64: 128, 128>}, {pipeline_mode = #tpu.pipeline_mode<synchronous>, transform_indices = @transform_15, window_bounds = array<i64: 1, 128>}, {transform_indices = @transform_16, window_bounds = array<i64: 1, 8, 128>}]} {
    %c8_i32 = arith.constant 8 : i32
    %0 = arith.muli %arg1, %c8_i32 : i32
    %1 = tpu.iota {dimensions = array<i32: 0>} : vector<8x128xi32>
    %2 = vector.broadcast %0 : i32 to vector<8x128xi32>
    %3 = arith.addi %2, %1 : vector<8x128xi32>
    %4 = arith.index_cast %arg0 : i32 to index
    %5 = memref.load %arg2[%4] : memref<2xi32, #tpu.memory_space<smem>>
    %6 = vector.broadcast %5 : i32 to vector<8x128xi32>
    %7 = arith.cmpi slt, %3, %6 : vector<8x128xi32>
    %8 = arith.extui %7 : vector<8x128xi1> to vector<8x128xi32>
    %9 = arith.sitofp %8 : vector<8x128xi32> to vector<8x128xf32>
    %10 = arith.index_cast %arg0 : i32 to index
    %11 = memref.load %arg3[%10] : memref<2xi32, #tpu.memory_space<smem>>
    %12 = vector.broadcast %11 : i32 to vector<8x128xi32>
    %13 = arith.cmpi slt, %3, %12 : vector<8x128xi32>
    %14 = arith.extui %13 : vector<8x128xi1> to vector<8x128xi32>
    %15 = arith.sitofp %14 : vector<8x128xi32> to vector<8x128xf32>
    %16 = tpu.iota {dimensions = array<i32: 1>} : vector<8x128xi32>
    %c32_i32 = arith.constant 32 : i32
    %17 = vector.broadcast %c32_i32 : i32 to vector<8x128xi32>
    %18 = arith.cmpi slt, %16, %17 : vector<8x128xi32>
    %c0 = arith.constant 0 : index
    %c0_0 = arith.constant 0 : index
    %19 = vector.load %arg6[%c0, %c0_0] : memref<8x128xbf16, #tpu.memory_space<vmem>>, vector<8x128xbf16>
    %20 = arith.extf %19 : vector<8x128xbf16> to vector<8x128xf32>
    %c0_1 = arith.constant 0 : index
    %c0_2 = arith.constant 0 : index
    %c0_3 = arith.constant 0 : index
    %21 = vector.load %arg4[%c0_1, %c0_2, %c0_3] : memref<1x8x128xbf16, #tpu.memory_space<vmem>>, vector<1x8x128xbf16>
    %22 = vector.shape_cast %21 : vector<1x8x128xbf16> to vector<8x128xbf16>
    %c0_4 = arith.constant 0 : index
    %c0_5 = arith.constant 0 : index
    %23 = vector.load %arg7[%c0_4, %c0_5] : memref<128x128xbf16, #tpu.memory_space<vmem>>, vector<128x128xbf16>
    %cst = arith.constant dense<0.000000e+00> : vector<8x128xf32>
    %24 = tpu.matmul %22, %23, %cst {dimension_numbers = #tpu.dot_dimension_numbers<[1], [0], [0], [1], [0, 0, 1, 1], [], []>} : vector<8x128xbf16>, vector<128x128xbf16>, vector<8x128xf32> -> vector<8x128xf32>
    %c0_6 = arith.constant 0 : index
    %c0_7 = arith.constant 0 : index
    %25 = vector.load %arg8[%c0_6, %c0_7] : memref<1x128xbf16, #tpu.memory_space<vmem>>, vector<1x128xbf16>
    %26 = arith.extf %25 : vector<1x128xbf16> to vector<1x128xf32>
    %27 = vector.broadcast %26 : vector<1x128xf32> to vector<8x128xf32>
    %28 = arith.addf %24, %27 : vector<8x128xf32>
    %29 = arith.truncf %28 : vector<8x128xf32> to vector<8x128xbf16>
    %c0_8 = arith.constant 0 : index
    %c0_9 = arith.constant 0 : index
    %30 = vector.load %arg9[%c0_8, %c0_9] : memref<128x128xbf16, #tpu.memory_space<vmem>>, vector<128x128xbf16>
    %cst_10 = arith.constant dense<0.000000e+00> : vector<8x128xf32>
    %31 = tpu.matmul %29, %30, %cst_10 {dimension_numbers = #tpu.dot_dimension_numbers<[1], [0], [0], [1], [0, 0, 1, 1], [], []>} : vector<8x128xbf16>, vector<128x128xbf16>, vector<8x128xf32> -> vector<8x128xf32>
    %c0_11 = arith.constant 0 : index
    %c0_12 = arith.constant 0 : index
    %32 = vector.load %arg10[%c0_11, %c0_12] : memref<1x128xbf16, #tpu.memory_space<vmem>>, vector<1x128xbf16>
    %33 = arith.extf %32 : vector<1x128xbf16> to vector<1x128xf32>
    %34 = vector.broadcast %33 : vector<1x128xf32> to vector<8x128xf32>
    %35 = arith.addf %31, %34 : vector<8x128xf32>
    %cst_13 = arith.constant dense<0.000000e+00> : vector<8xf32>
    %36 = vector.multi_reduction <add>, %35, %cst_13 [1] : vector<8x128xf32> to vector<8xf32>
    %37 = vector.shape_cast %36 : vector<8xf32> to vector<8x1xf32>
    %cst_14 = arith.constant 3.125000e-02 : f32
    %38 = vector.broadcast %cst_14 : f32 to vector<8x1xf32>
    %39 = arith.mulf %37, %38 : vector<8x1xf32>
    %40 = vector.broadcast %39 : vector<8x1xf32> to vector<8x128xf32>
    %41 = arith.subf %35, %40 : vector<8x128xf32>
    %cst_15 = arith.constant 0.000000e+00 : f32
    %42 = vector.broadcast %cst_15 : f32 to vector<8x128xf32>
    %43 = arith.select %18, %41, %42 : vector<8x128xi1>, vector<8x128xf32>
    %44 = arith.mulf %43, %43 : vector<8x128xf32>
    %cst_16 = arith.constant dense<0.000000e+00> : vector<8xf32>
    %45 = vector.multi_reduction <add>, %44, %cst_16 [1] : vector<8x128xf32> to vector<8xf32>
    %46 = vector.shape_cast %45 : vector<8xf32> to vector<8x1xf32>
    %cst_17 = arith.constant 3.125000e-02 : f32
    %47 = vector.broadcast %cst_17 : f32 to vector<8x1xf32>
    %48 = arith.mulf %46, %47 : vector<8x1xf32>
    %cst_18 = arith.constant 9.99999974E-6 : f32
    %49 = vector.broadcast %cst_18 : f32 to vector<8x1xf32>
    %50 = arith.addf %48, %49 : vector<8x1xf32>
    %51 = math.rsqrt %50 : vector<8x1xf32>
    %52 = vector.broadcast %51 : vector<8x1xf32> to vector<8x128xf32>
    %53 = arith.mulf %43, %52 : vector<8x128xf32>
    %c0_19 = arith.constant 0 : index
    %c0_20 = arith.constant 0 : index
    %54 = vector.load %arg11[%c0_19, %c0_20] : memref<1x128xbf16, #tpu.memory_space<vmem>>, vector<1x128xbf16>
    %55 = arith.extf %54 : vector<1x128xbf16> to vector<1x128xf32>
    %56 = vector.broadcast %55 : vector<1x128xf32> to vector<8x128xf32>
    %57 = arith.mulf %53, %56 : vector<8x128xf32>
    %c0_21 = arith.constant 0 : index
    %c0_22 = arith.constant 0 : index
    %58 = vector.load %arg12[%c0_21, %c0_22] : memref<1x128xbf16, #tpu.memory_space<vmem>>, vector<1x128xbf16>
    %59 = arith.extf %58 : vector<1x128xbf16> to vector<1x128xf32>
    %60 = vector.broadcast %59 : vector<1x128xf32> to vector<8x128xf32>
    %61 = arith.addf %57, %60 : vector<8x128xf32>
    %62 = arith.addf %61, %20 : vector<8x128xf32>
    %c0_23 = arith.constant 0 : index
    %c0_24 = arith.constant 0 : index
    %c0_25 = arith.constant 0 : index
    %63 = vector.load %arg5[%c0_23, %c0_24, %c0_25] : memref<1x8x128xbf16, #tpu.memory_space<vmem>>, vector<1x8x128xbf16>
    %64 = vector.shape_cast %63 : vector<1x8x128xbf16> to vector<8x128xbf16>
    %c0_26 = arith.constant 0 : index
    %c0_27 = arith.constant 0 : index
    %65 = vector.load %arg13[%c0_26, %c0_27] : memref<128x128xbf16, #tpu.memory_space<vmem>>, vector<128x128xbf16>
    %cst_28 = arith.constant dense<0.000000e+00> : vector<8x128xf32>
    %66 = tpu.matmul %64, %65, %cst_28 {dimension_numbers = #tpu.dot_dimension_numbers<[1], [0], [0], [1], [0, 0, 1, 1], [], []>} : vector<8x128xbf16>, vector<128x128xbf16>, vector<8x128xf32> -> vector<8x128xf32>
    %c0_29 = arith.constant 0 : index
    %c0_30 = arith.constant 0 : index
    %67 = vector.load %arg14[%c0_29, %c0_30] : memref<1x128xbf16, #tpu.memory_space<vmem>>, vector<1x128xbf16>
    %68 = arith.extf %67 : vector<1x128xbf16> to vector<1x128xf32>
    %69 = vector.broadcast %68 : vector<1x128xf32> to vector<8x128xf32>
    %70 = arith.addf %66, %69 : vector<8x128xf32>
    %cst_31 = arith.constant dense<0.000000e+00> : vector<8xf32>
    %71 = vector.multi_reduction <add>, %70, %cst_31 [1] : vector<8x128xf32> to vector<8xf32>
    %72 = vector.shape_cast %71 : vector<8xf32> to vector<8x1xf32>
    %cst_32 = arith.constant 3.125000e-02 : f32
    %73 = vector.broadcast %cst_32 : f32 to vector<8x1xf32>
    %74 = arith.mulf %72, %73 : vector<8x1xf32>
    %75 = vector.broadcast %74 : vector<8x1xf32> to vector<8x128xf32>
    %76 = arith.subf %70, %75 : vector<8x128xf32>
    %cst_33 = arith.constant 0.000000e+00 : f32
    %77 = vector.broadcast %cst_33 : f32 to vector<8x128xf32>
    %78 = arith.select %18, %76, %77 : vector<8x128xi1>, vector<8x128xf32>
    %79 = arith.mulf %78, %78 : vector<8x128xf32>
    %cst_34 = arith.constant dense<0.000000e+00> : vector<8xf32>
    %80 = vector.multi_reduction <add>, %79, %cst_34 [1] : vector<8x128xf32> to vector<8xf32>
    %81 = vector.shape_cast %80 : vector<8xf32> to vector<8x1xf32>
    %cst_35 = arith.constant 3.125000e-02 : f32
    %82 = vector.broadcast %cst_35 : f32 to vector<8x1xf32>
    %83 = arith.mulf %81, %82 : vector<8x1xf32>
    %cst_36 = arith.constant 9.99999974E-6 : f32
    %84 = vector.broadcast %cst_36 : f32 to vector<8x1xf32>
    %85 = arith.addf %83, %84 : vector<8x1xf32>
    %86 = math.rsqrt %85 : vector<8x1xf32>
    %87 = vector.broadcast %86 : vector<8x1xf32> to vector<8x128xf32>
    %88 = arith.mulf %78, %87 : vector<8x128xf32>
    %c0_37 = arith.constant 0 : index
    %c0_38 = arith.constant 0 : index
    %89 = vector.load %arg15[%c0_37, %c0_38] : memref<1x128xbf16, #tpu.memory_space<vmem>>, vector<1x128xbf16>
    %90 = arith.extf %89 : vector<1x128xbf16> to vector<1x128xf32>
    %91 = vector.broadcast %90 : vector<1x128xf32> to vector<8x128xf32>
    %92 = arith.mulf %88, %91 : vector<8x128xf32>
    %c0_39 = arith.constant 0 : index
    %c0_40 = arith.constant 0 : index
    %93 = vector.load %arg16[%c0_39, %c0_40] : memref<1x128xbf16, #tpu.memory_space<vmem>>, vector<1x128xbf16>
    %94 = arith.extf %93 : vector<1x128xbf16> to vector<1x128xf32>
    %95 = vector.broadcast %94 : vector<1x128xf32> to vector<8x128xf32>
    %96 = arith.addf %92, %95 : vector<8x128xf32>
    %97 = arith.addf %96, %20 : vector<8x128xf32>
    %98 = arith.mulf %62, %9 : vector<8x128xf32>
    %99 = arith.mulf %97, %15 : vector<8x128xf32>
    %100 = arith.truncf %98 : vector<8x128xf32> to vector<8x128xbf16>
    %c0_41 = arith.constant 0 : index
    %c0_42 = arith.constant 0 : index
    %101 = vector.load %arg17[%c0_41, %c0_42] : memref<128x128xbf16, #tpu.memory_space<vmem>>, vector<128x128xbf16>
    %cst_43 = arith.constant dense<0.000000e+00> : vector<8x128xf32>
    %102 = tpu.matmul %100, %101, %cst_43 {dimension_numbers = #tpu.dot_dimension_numbers<[1], [0], [0], [1], [0, 0, 1, 1], [], []>} : vector<8x128xbf16>, vector<128x128xbf16>, vector<8x128xf32> -> vector<8x128xf32>
    %103 = arith.truncf %99 : vector<8x128xf32> to vector<8x128xbf16>
    %c0_44 = arith.constant 0 : index
    %c0_45 = arith.constant 0 : index
    %104 = vector.load %arg18[%c0_44, %c0_45] : memref<128x128xbf16, #tpu.memory_space<vmem>>, vector<128x128xbf16>
    %cst_46 = arith.constant dense<0.000000e+00> : vector<8x128xf32>
    %105 = tpu.matmul %103, %104, %cst_46 {dimension_numbers = #tpu.dot_dimension_numbers<[1], [0], [0], [1], [0, 0, 1, 1], [], []>} : vector<8x128xbf16>, vector<128x128xbf16>, vector<8x128xf32> -> vector<8x128xf32>
    %106 = arith.addf %102, %105 : vector<8x128xf32>
    %c0_47 = arith.constant 0 : index
    %c0_48 = arith.constant 0 : index
    %107 = vector.load %arg19[%c0_47, %c0_48] : memref<1x128xbf16, #tpu.memory_space<vmem>>, vector<1x128xbf16>
    %108 = arith.extf %107 : vector<1x128xbf16> to vector<1x128xf32>
    %109 = vector.broadcast %108 : vector<1x128xf32> to vector<8x128xf32>
    %110 = arith.addf %106, %109 : vector<8x128xf32>
    %111 = arith.negf %110 : vector<8x128xf32>
    %112 = math.exp %111 : vector<8x128xf32>
    %cst_49 = arith.constant 1.000000e+00 : f32
    %113 = vector.broadcast %cst_49 : f32 to vector<8x128xf32>
    %114 = arith.addf %113, %112 : vector<8x128xf32>
    %115 = arith.divf %113, %114 : vector<8x128xf32>
    %116 = arith.mulf %115, %98 : vector<8x128xf32>
    %cst_50 = arith.constant 1.000000e+00 : f32
    %117 = vector.broadcast %cst_50 : f32 to vector<8x128xf32>
    %118 = arith.subf %117, %115 : vector<8x128xf32>
    %119 = arith.mulf %118, %99 : vector<8x128xf32>
    %120 = arith.addf %116, %119 : vector<8x128xf32>
    %121 = arith.addf %120, %62 : vector<8x128xf32>
    %122 = arith.addf %121, %97 : vector<8x128xf32>
    %123 = arith.truncf %122 : vector<8x128xf32> to vector<8x128xbf16>
    %c0_51 = arith.constant 0 : index
    %c0_52 = arith.constant 0 : index
    %c0_53 = arith.constant 0 : index
    %124 = vector.load %arg20[%c0_51, %c0_52, %c0_53] : memref<1x8x128xbf16, #tpu.memory_space<vmem>>, vector<1x8x128xbf16>
    %125 = vector.shape_cast %124 : vector<1x8x128xbf16> to vector<8x128xbf16>
    %126 = vector.shape_cast %123 : vector<8x128xbf16> to vector<1x8x128xbf16>
    tpu.vector_store %arg20[%c0_51, %c0_52, %c0_53], %126 {strides = array<i32>} : memref<1x8x128xbf16, #tpu.memory_space<vmem>>, vector<1x8x128xbf16>,
    return
  }
  func.func @transform_0(%arg0: i32, %arg1: i32, %arg2: memref<2xi32, #tpu.memory_space<smem>>, %arg3: memref<2xi32, #tpu.memory_space<smem>>) -> (i32, i32, i32) {
    %c0_i32 = arith.constant 0 : i32
    %c0_i32_0 = arith.constant 0 : i32
    return %arg0, %arg1, %c0_i32 : i32, i32, i32
  }
  func.func @transform_1(%arg0: i32, %arg1: i32, %arg2: memref<2xi32, #tpu.memory_space<smem>>, %arg3: memref<2xi32, #tpu.memory_space<smem>>) -> (i32, i32, i32) {
    %c0_i32 = arith.constant 0 : i32
    %c0_i32_0 = arith.constant 0 : i32
    return %arg0, %arg1, %c0_i32 : i32, i32, i32
  }
  func.func @transform_2(%arg0: i32, %arg1: i32, %arg2: memref<2xi32, #tpu.memory_space<smem>>, %arg3: memref<2xi32, #tpu.memory_space<smem>>) -> (i32, i32) {
    %c0_i32 = arith.constant 0 : i32
    %c0_i32_0 = arith.constant 0 : i32
    return %arg1, %c0_i32 : i32, i32
  }
  func.func @transform_3(%arg0: i32, %arg1: i32, %arg2: memref<2xi32, #tpu.memory_space<smem>>, %arg3: memref<2xi32, #tpu.memory_space<smem>>) -> (i32, i32) {
    %c0_i32 = arith.constant 0 : i32
    %c0_i32_0 = arith.constant 0 : i32
    %c0_i32_1 = arith.constant 0 : i32
    return %c0_i32, %c0_i32_0 : i32, i32
  }
  func.func @transform_4(%arg0: i32, %arg1: i32, %arg2: memref<2xi32, #tpu.memory_space<smem>>, %arg3: memref<2xi32, #tpu.memory_space<smem>>) -> (i32, i32) {
    %c0_i32 = arith.constant 0 : i32
    %c0_i32_0 = arith.constant 0 : i32
    %c0_i32_1 = arith.constant 0 : i32
    return %c0_i32, %c0_i32_0 : i32, i32
  }
  func.func @transform_5(%arg0: i32, %arg1: i32, %arg2: memref<2xi32, #tpu.memory_space<smem>>, %arg3: memref<2xi32, #tpu.memory_space<smem>>) -> (i32, i32) {
    %c0_i32 = arith.constant 0 : i32
    %c0_i32_0 = arith.constant 0 : i32
    %c0_i32_1 = arith.constant 0 : i32
    return %c0_i32, %c0_i32_0 : i32, i32
  }
  func.func @transform_6(%arg0: i32, %arg1: i32, %arg2: memref<2xi32, #tpu.memory_space<smem>>, %arg3: memref<2xi32, #tpu.memory_space<smem>>) -> (i32, i32) {
    %c0_i32 = arith.constant 0 : i32
    %c0_i32_0 = arith.constant 0 : i32
    %c0_i32_1 = arith.constant 0 : i32
    return %c0_i32, %c0_i32_0 : i32, i32
  }
  func.func @transform_7(%arg0: i32, %arg1: i32, %arg2: memref<2xi32, #tpu.memory_space<smem>>, %arg3: memref<2xi32, #tpu.memory_space<smem>>) -> (i32, i32) {
    %c0_i32 = arith.constant 0 : i32
    %c0_i32_0 = arith.constant 0 : i32
    %c0_i32_1 = arith.constant 0 : i32
    return %c0_i32, %c0_i32_0 : i32, i32
  }
  func.func @transform_8(%arg0: i32, %arg1: i32, %arg2: memref<2xi32, #tpu.memory_space<smem>>, %arg3: memref<2xi32, #tpu.memory_space<smem>>) -> (i32, i32) {
    %c0_i32 = arith.constant 0 : i32
    %c0_i32_0 = arith.constant 0 : i32
    %c0_i32_1 = arith.constant 0 : i32
    return %c0_i32, %c0_i32_0 : i32, i32
  }
  func.func @transform_9(%arg0: i32, %arg1: i32, %arg2: memref<2xi32, #tpu.memory_space<smem>>, %arg3: memref<2xi32, #tpu.memory_space<smem>>) -> (i32, i32) {
    %c0_i32 = arith.constant 0 : i32
    %c0_i32_0 = arith.constant 0 : i32
    %c0_i32_1 = arith.constant 0 : i32
    return %c0_i32, %c0_i32_0 : i32, i32
  }
  func.func @transform_10(%arg0: i32, %arg1: i32, %arg2: memref<2xi32, #tpu.memory_space<smem>>, %arg3: memref<2xi32, #tpu.memory_space<smem>>) -> (i32, i32) {
    %c0_i32 = arith.constant 0 : i32
    %c0_i32_0 = arith.constant 0 : i32
    %c0_i32_1 = arith.constant 0 : i32
    return %c0_i32, %c0_i32_0 : i32, i32
  }
  func.func @transform_11(%arg0: i32, %arg1: i32, %arg2: memref<2xi32, #tpu.memory_space<smem>>, %arg3: memref<2xi32, #tpu.memory_space<smem>>) -> (i32, i32) {
    %c0_i32 = arith.constant 0 : i32
    %c0_i32_0 = arith.constant 0 : i32
    %c0_i32_1 = arith.constant 0 : i32
    return %c0_i32, %c0_i32_0 : i32, i32
  }
  func.func @transform_12(%arg0: i32, %arg1: i32, %arg2: memref<2xi32, #tpu.memory_space<smem>>, %arg3: memref<2xi32, #tpu.memory_space<smem>>) -> (i32, i32) {
    %c0_i32 = arith.constant 0 : i32
    %c0_i32_0 = arith.constant 0 : i32
    %c0_i32_1 = arith.constant 0 : i32
    return %c0_i32, %c0_i32_0 : i32, i32
  }
  func.func @transform_13(%arg0: i32, %arg1: i32, %arg2: memref<2xi32, #tpu.memory_space<smem>>, %arg3: memref<2xi32, #tpu.memory_space<smem>>) -> (i32, i32) {
    %c0_i32 = arith.constant 0 : i32
    %c0_i32_0 = arith.constant 0 : i32
    %c0_i32_1 = arith.constant 0 : i32
    return %c0_i32, %c0_i32_0 : i32, i32
  }
  func.func @transform_14(%arg0: i32, %arg1: i32, %arg2: memref<2xi32, #tpu.memory_space<smem>>, %arg3: memref<2xi32, #tpu.memory_space<smem>>) -> (i32, i32) {
    %c0_i32 = arith.constant 0 : i32
    %c0_i32_0 = arith.constant 0 : i32
    %c0_i32_1 = arith.constant 0 : i32
    return %c0_i32, %c0_i32_0 : i32, i32
  }
  func.func @transform_15(%arg0: i32, %arg1: i32, %arg2: memref<2xi32, #tpu.memory_space<smem>>, %arg3: memref<2xi32, #tpu.memory_space<smem>>) -> (i32, i32) {
    %c0_i32 = arith.constant 0 : i32
    %c0_i32_0 = arith.constant 0 : i32
    %c0_i32_1 = arith.constant 0 : i32
    return %c0_i32, %c0_i32_0 : i32, i32
  }
  func.func @transform_16(%arg0: i32, %arg1: i32, %arg2: memref<2xi32, #tpu.memory_space<smem>>, %arg3: memref<2xi32, #tpu.memory_space<smem>>) -> (i32, i32, i32) {
    %c0_i32 = arith.constant 0 : i32
    %c0_i32_0 = arith.constant 0 : i32
    return %arg0, %arg1, %c0_i32 : i32, i32, i32
  }
}

module attributes {stable_mosaic.version = 11 : i64} {
  func.func @fused_prenet_kernel(%arg0: i32, %arg1: i32, %arg2: memref<2xi32, #tpu.memory_space<smem>>, %arg3: memref<2xi32, #tpu.memory_space<smem>>, %arg4: memref<1x8x128xbf16, #tpu.memory_space<vmem>>, %arg5: memref<1x8x128xbf16, #tpu.memory_space<vmem>>, %arg6: memref<8x128xbf16, #tpu.memory_space<vmem>>, %arg7: memref<128x128xbf16, #tpu.memory_space<vmem>>, %arg8: memref<1x128xbf16, #tpu.memory_space<vmem>>, %arg9: memref<128x128xbf16, #tpu.memory_space<vmem>>, %arg10: memref<1x128xbf16, #tpu.memory_space<vmem>>, %arg11: memref<1x128xbf16, #tpu.memory_space<vmem>>, %arg12: memref<1x128xbf16, #tpu.memory_space<vmem>>, %arg13: memref<128x128xbf16, #tpu.memory_space<vmem>>, %arg14: memref<1x128xbf16, #tpu.memory_space<vmem>>, %arg15: memref<1x128xbf16, #tpu.memory_space<vmem>>, %arg16: memref<1x128xbf16, #tpu.memory_space<vmem>>, %arg17: memref<128x128xbf16, #tpu.memory_space<vmem>>, %arg18: memref<128x128xbf16, #tpu.memory_space<vmem>>, %arg19: memref<1x128xbf16, #tpu.memory_space<vmem>>, %arg20: memref<1x8x128xbf16, #tpu.memory_space<vmem>>) attributes {dimension_semantics = [#tpu.dimension_semantics<parallel>, #tpu.dimension_semantics<parallel>], iteration_bounds = array<i64: 2, 1>, scalar_prefetch = 2 : i64, scratch_operands = 0 : i64, tpu.core_type = #tpu.core_type<tc>, window_params = [{transform_indices = @transform_0, window_bounds = array<i64: 1, 8, 128>}, {transform_indices = @transform_1, window_bounds = array<i64: 1, 8, 128>}, {transform_indices = @transform_2, window_bounds = array<i64: 8, 128>}, {pipeline_mode = #tpu.pipeline_mode<synchronous>, transform_indices = @transform_3, window_bounds = array<i64: 128, 128>}, {pipeline_mode = #tpu.pipeline_mode<synchronous>, transform_indices = @transform_4, window_bounds = array<i64: 1, 128>}, {pipeline_mode = #tpu.pipeline_mode<synchronous>, transform_indices = @transform_5, window_bounds = array<i64: 128, 128>}, {pipeline_mode = #tpu.pipeline_mode<synchronous>, transform_indices = @transform_6, window_bounds = array<i64: 1, 128>}, {pipeline_mode = #tpu.pipeline_mode<synchronous>, transform_indices = @transform_7, window_bounds = array<i64: 1, 128>}, {pipeline_mode = #tpu.pipeline_mode<synchronous>, transform_indices = @transform_8, window_bounds = array<i64: 1, 128>}, {pipeline_mode = #tpu.pipeline_mode<synchronous>, transform_indices = @transform_9, window_bounds = array<i64: 128, 128>}, {pipeline_mode = #tpu.pipeline_mode<synchronous>, transform_indices = @transform_10, window_bounds = array<i64: 1, 128>}, {pipeline_mode = #tpu.pipeline_mode<synchronous>, transform_indices = @transform_11, window_bounds = array<i64: 1, 128>}, {pipeline_mode = #tpu.pipeline_mode<synchronous>, transform_indices = @transform_12, window_bounds = array<i64: 1, 128>}, {pipeline_mode = #tpu.pipeline_mode<synchronous>, transform_indices = @transform_13, window_bounds = array<i64: 128, 128>}, {pipeline_mode = #tpu.pipeline_mode<synchronous>, transform_indices = @transform_14, window_bounds = array<i64: 128, 128>}, {pipeline_mode = #tpu.pipeline_mode<synchronous>, transform_indices = @transform_15, window_bounds = array<i64: 1, 128>}, {transform_indices = @transform_16, window_bounds = array<i64: 1, 8, 128>}]} {
    %c8_i32 = arith.constant 8 : i32
    %0 = arith.muli %arg1, %c8_i32 : i32
    %1 = tpu.iota {dimensions = array<i32: 0>} : vector<8x128xi32>
    %2 = vector.broadcast %0 : i32 to vector<8x128xi32>
    %3 = arith.addi %2, %1 : vector<8x128xi32>
    %4 = arith.index_cast %arg0 : i32 to index
    %5 = memref.load %arg2[%4] : memref<2xi32, #tpu.memory_space<smem>>
    %6 = vector.broadcast %5 : i32 to vector<8x128xi32>
    %7 = arith.cmpi slt, %3, %6 : vector<8x128xi32>
    %8 = arith.extui %7 : vector<8x128xi1> to vector<8x128xi32>
    %9 = arith.sitofp %8 : vector<8x128xi32> to vector<8x128xf32>
    %10 = arith.index_cast %arg0 : i32 to index
    %11 = memref.load %arg3[%10] : memref<2xi32, #tpu.memory_space<smem>>
    %12 = vector.broadcast %11 : i32 to vector<8x128xi32>
    %13 = arith.cmpi slt, %3, %12 : vector<8x128xi32>
    %14 = arith.extui %13 : vector<8x128xi1> to vector<8x128xi32>
    %15 = arith.sitofp %14 : vector<8x128xi32> to vector<8x128xf32>
    %16 = tpu.iota {dimensions = array<i32: 1>} : vector<8x128xi32>
    %c32_i32 = arith.constant 32 : i32
    %17 = vector.broadcast %c32_i32 : i32 to vector<8x128xi32>
    %18 = arith.cmpi slt, %16, %17 : vector<8x128xi32>
    %c0 = arith.constant 0 : index
    %c0_0 = arith.constant 0 : index
    %19 = vector.load %arg6[%c0, %c0_0] : memref<8x128xbf16, #tpu.memory_space<vmem>>, vector<8x128xbf16>
    %20 = arith.extf %19 : vector<8x128xbf16> to vector<8x128xf32>
    %c0_1 = arith.constant 0 : index
    %c0_2 = arith.constant 0 : index
    %c0_3 = arith.constant 0 : index
    %21 = vector.load %arg4[%c0_1, %c0_2, %c0_3] : memref<1x8x128xbf16, #tpu.memory_space<vmem>>, vector<1x8x128xbf16>
    %22 = vector.shape_cast %21 : vector<1x8x128xbf16> to vector<8x128xbf16>
    %c0_4 = arith.constant 0 : index
    %c0_5 = arith.constant 0 : index
    %23 = vector.load %arg7[%c0_4, %c0_5] : memref<128x128xbf16, #tpu.memory_space<vmem>>, vector<128x128xbf16>
    %cst = arith.constant dense<0.000000e+00> : vector<8x128xf32>
    %24 = tpu.matmul %22, %23, %cst {dimension_numbers = #tpu.dot_dimension_numbers<[1], [0], [0], [1], [0, 0, 1, 1], [], []>} : vector<8x128xbf16>, vector<128x128xbf16>, vector<8x128xf32> -> vector<8x128xf32>
    %c0_6 = arith.constant 0 : index
    %c0_7 = arith.constant 0 : index
    %25 = vector.load %arg8[%c0_6, %c0_7] : memref<1x128xbf16, #tpu.memory_space<vmem>>, vector<1x128xbf16>
    %26 = arith.extf %25 : vector<1x128xbf16> to vector<1x128xf32>
    %27 = vector.broadcast %26 : vector<1x128xf32> to vector<8x128xf32>
    %28 = arith.addf %24, %27 : vector<8x128xf32>
    %29 = arith.truncf %28 : vector<8x128xf32> to vector<8x128xbf16>
    %c0_8 = arith.constant 0 : index
    %c0_9 = arith.constant 0 : index
    %30 = vector.load %arg9[%c0_8, %c0_9] : memref<128x128xbf16, #tpu.memory_space<vmem>>, vector<128x128xbf16>
    %cst_10 = arith.constant dense<0.000000e+00> : vector<8x128xf32>
    %31 = tpu.matmul %29, %30, %cst_10 {dimension_numbers = #tpu.dot_dimension_numbers<[1], [0], [0], [1], [0, 0, 1, 1], [], []>} : vector<8x128xbf16>, vector<128x128xbf16>, vector<8x128xf32> -> vector<8x128xf32>
    %c0_11 = arith.constant 0 : index
    %c0_12 = arith.constant 0 : index
    %32 = vector.load %arg10[%c0_11, %c0_12] : memref<1x128xbf16, #tpu.memory_space<vmem>>, vector<1x128xbf16>
    %33 = arith.extf %32 : vector<1x128xbf16> to vector<1x128xf32>
    %34 = vector.broadcast %33 : vector<1x128xf32> to vector<8x128xf32>
    %35 = arith.addf %31, %34 : vector<8x128xf32>
    %cst_13 = arith.constant dense<0.000000e+00> : vector<8xf32>
    %36 = vector.multi_reduction <add>, %35, %cst_13 [1] : vector<8x128xf32> to vector<8xf32>
    %37 = vector.shape_cast %36 : vector<8xf32> to vector<8x1xf32>
    %cst_14 = arith.constant 3.125000e-02 : f32
    %38 = vector.broadcast %cst_14 : f32 to vector<8x1xf32>
    %39 = arith.mulf %37, %38 : vector<8x1xf32>
    %40 = vector.broadcast %39 : vector<8x1xf32> to vector<8x128xf32>
    %41 = arith.subf %35, %40 : vector<8x128xf32>
    %cst_15 = arith.constant 0.000000e+00 : f32
    %42 = vector.broadcast %cst_15 : f32 to vector<8x128xf32>
    %43 = arith.select %18, %41, %42 : vector<8x128xi1>, vector<8x128xf32>
    %44 = arith.mulf %43, %43 : vector<8x128xf32>
    %cst_16 = arith.constant dense<0.000000e+00> : vector<8xf32>
    %45 = vector.multi_reduction <add>, %44, %cst_16 [1] : vector<8x128xf32> to vector<8xf32>
    %46 = vector.shape_cast %45 : vector<8xf32> to vector<8x1xf32>
    %cst_17 = arith.constant 3.125000e-02 : f32
    %47 = vector.broadcast %cst_17 : f32 to vector<8x1xf32>
    %48 = arith.mulf %46, %47 : vector<8x1xf32>
    %cst_18 = arith.constant 9.99999974E-6 : f32
    %49 = vector.broadcast %cst_18 : f32 to vector<8x1xf32>
    %50 = arith.addf %48, %49 : vector<8x1xf32>
    %51 = math.rsqrt %50 : vector<8x1xf32>
    %52 = vector.broadcast %51 : vector<8x1xf32> to vector<8x128xf32>
    %53 = arith.mulf %43, %52 : vector<8x128xf32>
    %c0_19 = arith.constant 0 : index
    %c0_20 = arith.constant 0 : index
    %54 = vector.load %arg11[%c0_19, %c0_20] : memref<1x128xbf16, #tpu.memory_space<vmem>>, vector<1x128xbf16>
    %55 = arith.extf %54 : vector<1x128xbf16> to vector<1x128xf32>
    %56 = vector.broadcast %55 : vector<1x128xf32> to vector<8x128xf32>
    %57 = arith.mulf %53, %56 : vector<8x128xf32>
    %c0_21 = arith.constant 0 : index
    %c0_22 = arith.constant 0 : index
    %58 = vector.load %arg12[%c0_21, %c0_22] : memref<1x128xbf16, #tpu.memory_space<vmem>>, vector<1x128xbf16>
    %59 = arith.extf %58 : vector<1x128xbf16> to vector<1x128xf32>
    %60 = vector.broadcast %59 : vector<1x128xf32> to vector<8x128xf32>
    %61 = arith.addf %57, %60 : vector<8x128xf32>
    %62 = arith.addf %61, %20 : vector<8x128xf32>
    %c0_23 = arith.constant 0 : index
    %c0_24 = arith.constant 0 : index
    %c0_25 = arith.constant 0 : index
    %63 = vector.load %arg5[%c0_23, %c0_24, %c0_25] : memref<1x8x128xbf16, #tpu.memory_space<vmem>>, vector<1x8x128xbf16>
    %64 = vector.shape_cast %63 : vector<1x8x128xbf16> to vector<8x128xbf16>
    %c0_26 = arith.constant 0 : index
    %c0_27 = arith.constant 0 : index
    %65 = vector.load %arg13[%c0_26, %c0_27] : memref<128x128xbf16, #tpu.memory_space<vmem>>, vector<128x128xbf16>
    %cst_28 = arith.constant dense<0.000000e+00> : vector<8x128xf32>
    %66 = tpu.matmul %64, %65, %cst_28 {dimension_numbers = #tpu.dot_dimension_numbers<[1], [0], [0], [1], [0, 0, 1, 1], [], []>} : vector<8x128xbf16>, vector<128x128xbf16>, vector<8x128xf32> -> vector<8x128xf32>
    %c0_29 = arith.constant 0 : index
    %c0_30 = arith.constant 0 : index
    %67 = vector.load %arg14[%c0_29, %c0_30] : memref<1x128xbf16, #tpu.memory_space<vmem>>, vector<1x128xbf16>
    %68 = arith.extf %67 : vector<1x128xbf16> to vector<1x128xf32>
    %69 = vector.broadcast %68 : vector<1x128xf32> to vector<8x128xf32>
    %70 = arith.addf %66, %69 : vector<8x128xf32>
    %cst_31 = arith.constant dense<0.000000e+00> : vector<8xf32>
    %71 = vector.multi_reduction <add>, %70, %cst_31 [1] : vector<8x128xf32> to vector<8xf32>
    %72 = vector.shape_cast %71 : vector<8xf32> to vector<8x1xf32>
    %cst_32 = arith.constant 3.125000e-02 : f32
    %73 = vector.broadcast %cst_32 : f32 to vector<8x1xf32>
    %74 = arith.mulf %72, %73 : vector<8x1xf32>
    %75 = vector.broadcast %74 : vector<8x1xf32> to vector<8x128xf32>
    %76 = arith.subf %70, %75 : vector<8x128xf32>
    %cst_33 = arith.constant 0.000000e+00 : f32
    %77 = vector.broadcast %cst_33 : f32 to vector<8x128xf32>
    %78 = arith.select %18, %76, %77 : vector<8x128xi1>, vector<8x128xf32>
    %79 = arith.mulf %78, %78 : vector<8x128xf32>
    %cst_34 = arith.constant dense<0.000000e+00> : vector<8xf32>
    %80 = vector.multi_reduction <add>, %79, %cst_34 [1] : vector<8x128xf32> to vector<8xf32>
    %81 = vector.shape_cast %80 : vector<8xf32> to vector<8x1xf32>
    %cst_35 = arith.constant 3.125000e-02 : f32
    %82 = vector.broadcast %cst_35 : f32 to vector<8x1xf32>
    %83 = arith.mulf %81, %82 : vector<8x1xf32>
    %cst_36 = arith.constant 9.99999974E-6 : f32
    %84 = vector.broadcast %cst_36 : f32 to vector<8x1xf32>
    %85 = arith.addf %83, %84 : vector<8x1xf32>
    %86 = math.rsqrt %85 : vector<8x1xf32>
    %87 = vector.broadcast %86 : vector<8x1xf32> to vector<8x128xf32>
    %88 = arith.mulf %78, %87 : vector<8x128xf32>
    %c0_37 = arith.constant 0 : index
    %c0_38 = arith.constant 0 : index
    %89 = vector.load %arg15[%c0_37, %c0_38] : memref<1x128xbf16, #tpu.memory_space<vmem>>, vector<1x128xbf16>
    %90 = arith.extf %89 : vector<1x128xbf16> to vector<1x128xf32>
    %91 = vector.broadcast %90 : vector<1x128xf32> to vector<8x128xf32>
    %92 = arith.mulf %88, %91 : vector<8x128xf32>
    %c0_39 = arith.constant 0 : index
    %c0_40 = arith.constant 0 : index
    %93 = vector.load %arg16[%c0_39, %c0_40] : memref<1x128xbf16, #tpu.memory_space<vmem>>, vector<1x128xbf16>
    %94 = arith.extf %93 : vector<1x128xbf16> to vector<1x128xf32>
    %95 = vector.broadcast %94 : vector<1x128xf32> to vector<8x128xf32>
    %96 = arith.addf %92, %95 : vector<8x128xf32>
    %97 = arith.addf %96, %20 : vector<8x128xf32>
    %98 = arith.mulf %62, %9 : vector<8x128xf32>
    %99 = arith.mulf %97, %15 : vector<8x128xf32>
    %100 = arith.truncf %98 : vector<8x128xf32> to vector<8x128xbf16>
    %c0_41 = arith.constant 0 : index
    %c0_42 = arith.constant 0 : index
    %101 = vector.load %arg17[%c0_41, %c0_42] : memref<128x128xbf16, #tpu.memory_space<vmem>>, vector<128x128xbf16>
    %cst_43 = arith.constant dense<0.000000e+00> : vector<8x128xf32>
    %102 = tpu.matmul %100, %101, %cst_43 {dimension_numbers = #tpu.dot_dimension_numbers<[1], [0], [0], [1], [0, 0, 1, 1], [], []>} : vector<8x128xbf16>, vector<128x128xbf16>, vector<8x128xf32> -> vector<8x128xf32>
    %103 = arith.truncf %99 : vector<8x128xf32> to vector<8x128xbf16>
    %c0_44 = arith.constant 0 : index
    %c0_45 = arith.constant 0 : index
    %104 = vector.load %arg18[%c0_44, %c0_45] : memref<128x128xbf16, #tpu.memory_space<vmem>>, vector<128x128xbf16>
    %cst_46 = arith.constant dense<0.000000e+00> : vector<8x128xf32>
    %105 = tpu.matmul %103, %104, %cst_46 {dimension_numbers = #tpu.dot_dimension_numbers<[1], [0], [0], [1], [0, 0, 1, 1], [], []>} : vector<8x128xbf16>, vector<128x128xbf16>, vector<8x128xf32> -> vector<8x128xf32>
    %106 = arith.addf %102, %105 : vector<8x128xf32>
    %c0_47 = arith.constant 0 : index
    %c0_48 = arith.constant 0 : index
    %107 = vector.load %arg19[%c0_47, %c0_48] : memref<1x128xbf16, #tpu.memory_space<vmem>>, vector<1x128xbf16>
    %108 = arith.extf %107 : vector<1x128xbf16> to vector<1x128xf32>
    %109 = vector.broadcast %108 : vector<1x128xf32> to vector<8x128xf32>
    %110 = arith.addf %106, %109 : vector<8x128xf32>
    %111 = arith.negf %110 : vector<8x128xf32>
    %112 = math.exp %111 : vector<8x128xf32>
    %cst_49 = arith.constant 1.000000e+00 : f32
    %113 = vector.broadcast %cst_49 : f32 to vector<8x128xf32>
    %114 = arith.addf %113, %112 : vector<8x128xf32>
    %115 = arith.divf %113, %114 : vector<8x128xf32>
    %116 = arith.mulf %115, %98 : vector<8x128xf32>
    %cst_50 = arith.constant 1.000000e+00 : f32
    %117 = vector.broadcast %cst_50 : f32 to vector<8x128xf32>
    %118 = arith.subf %117, %115 : vector<8x128xf32>
    %119 = arith.mulf %118, %99 : vector<8x128xf32>
    %120 = arith.addf %116, %119 : vector<8x128xf32>
    %121 = arith.addf %120, %62 : vector<8x128xf32>
    %122 = arith.addf %121, %97 : vector<8x128xf32>
    %123 = arith.truncf %122 : vector<8x128xf32> to vector<8x128xbf16>
    %c0_51 = arith.constant 0 : index
    %c0_52 = arith.constant 0 : index
    %c0_53 = arith.constant 0 : index
    %124 = vector.load %arg20[%c0_51, %c0_52, %c0_53] : memref<1x8x128xbf16, #tpu.memory_space<vmem>>, vector<1x8x128xbf16>
    %125 = vector.shape_cast %124 : vector<1x8x128xbf16> to vector<8x128xbf16>
    %126 = vector.shape_cast %123 : vector<8x128xbf16> to vector<1x8x128xbf16>
    tpu.vector_store %arg20[%c0_51, %c0_52, %c0_53], %126 {strides = array<i32>} : memref<1x8x128xbf16, #tpu.memory_space<vmem>>, vector<1x8x128xbf16>,
    return
  }
  func.func @transform_0(%arg0: i32, %arg1: i32, %arg2: memref<2xi32, #tpu.memory_space<smem>>, %arg3: memref<2xi32, #tpu.memory_space<smem>>) -> (i32, i32, i32) {
    %c0_i32 = arith.constant 0 : i32
    %c0_i32_0 = arith.constant 0 : i32
    return %arg0, %arg1, %c0_i32 : i32, i32, i32
  }
  func.func @transform_1(%arg0: i32, %arg1: i32, %arg2: memref<2xi32, #tpu.memory_space<smem>>, %arg3: memref<2xi32, #tpu.memory_space<smem>>) -> (i32, i32, i32) {
    %c0_i32 = arith.constant 0 : i32
    %c0_i32_0 = arith.constant 0 : i32
    return %arg0, %arg1, %c0_i32 : i32, i32, i32
  }
  func.func @transform_2(%arg0: i32, %arg1: i32, %arg2: memref<2xi32, #tpu.memory_space<smem>>, %arg3: memref<2xi32, #tpu.memory_space<smem>>) -> (i32, i32) {
    %c0_i32 = arith.constant 0 : i32
    %c0_i32_0 = arith.constant 0 : i32
    return %arg1, %c0_i32 : i32, i32
  }
  func.func @transform_3(%arg0: i32, %arg1: i32, %arg2: memref<2xi32, #tpu.memory_space<smem>>, %arg3: memref<2xi32, #tpu.memory_space<smem>>) -> (i32, i32) {
    %c0_i32 = arith.constant 0 : i32
    %c0_i32_0 = arith.constant 0 : i32
    %c0_i32_1 = arith.constant 0 : i32
    return %c0_i32, %c0_i32_0 : i32, i32
  }
  func.func @transform_4(%arg0: i32, %arg1: i32, %arg2: memref<2xi32, #tpu.memory_space<smem>>, %arg3: memref<2xi32, #tpu.memory_space<smem>>) -> (i32, i32) {
    %c0_i32 = arith.constant 0 : i32
    %c0_i32_0 = arith.constant 0 : i32
    %c0_i32_1 = arith.constant 0 : i32
    return %c0_i32, %c0_i32_0 : i32, i32
  }
  func.func @transform_5(%arg0: i32, %arg1: i32, %arg2: memref<2xi32, #tpu.memory_space<smem>>, %arg3: memref<2xi32, #tpu.memory_space<smem>>) -> (i32, i32) {
    %c0_i32 = arith.constant 0 : i32
    %c0_i32_0 = arith.constant 0 : i32
    %c0_i32_1 = arith.constant 0 : i32
    return %c0_i32, %c0_i32_0 : i32, i32
  }
  func.func @transform_6(%arg0: i32, %arg1: i32, %arg2: memref<2xi32, #tpu.memory_space<smem>>, %arg3: memref<2xi32, #tpu.memory_space<smem>>) -> (i32, i32) {
    %c0_i32 = arith.constant 0 : i32
    %c0_i32_0 = arith.constant 0 : i32
    %c0_i32_1 = arith.constant 0 : i32
    return %c0_i32, %c0_i32_0 : i32, i32
  }
  func.func @transform_7(%arg0: i32, %arg1: i32, %arg2: memref<2xi32, #tpu.memory_space<smem>>, %arg3: memref<2xi32, #tpu.memory_space<smem>>) -> (i32, i32) {
    %c0_i32 = arith.constant 0 : i32
    %c0_i32_0 = arith.constant 0 : i32
    %c0_i32_1 = arith.constant 0 : i32
    return %c0_i32, %c0_i32_0 : i32, i32
  }
  func.func @transform_8(%arg0: i32, %arg1: i32, %arg2: memref<2xi32, #tpu.memory_space<smem>>, %arg3: memref<2xi32, #tpu.memory_space<smem>>) -> (i32, i32) {
    %c0_i32 = arith.constant 0 : i32
    %c0_i32_0 = arith.constant 0 : i32
    %c0_i32_1 = arith.constant 0 : i32
    return %c0_i32, %c0_i32_0 : i32, i32
  }
  func.func @transform_9(%arg0: i32, %arg1: i32, %arg2: memref<2xi32, #tpu.memory_space<smem>>, %arg3: memref<2xi32, #tpu.memory_space<smem>>) -> (i32, i32) {
    %c0_i32 = arith.constant 0 : i32
    %c0_i32_0 = arith.constant 0 : i32
    %c0_i32_1 = arith.constant 0 : i32
    return %c0_i32, %c0_i32_0 : i32, i32
  }
  func.func @transform_10(%arg0: i32, %arg1: i32, %arg2: memref<2xi32, #tpu.memory_space<smem>>, %arg3: memref<2xi32, #tpu.memory_space<smem>>) -> (i32, i32) {
    %c0_i32 = arith.constant 0 : i32
    %c0_i32_0 = arith.constant 0 : i32
    %c0_i32_1 = arith.constant 0 : i32
    return %c0_i32, %c0_i32_0 : i32, i32
  }
  func.func @transform_11(%arg0: i32, %arg1: i32, %arg2: memref<2xi32, #tpu.memory_space<smem>>, %arg3: memref<2xi32, #tpu.memory_space<smem>>) -> (i32, i32) {
    %c0_i32 = arith.constant 0 : i32
    %c0_i32_0 = arith.constant 0 : i32
    %c0_i32_1 = arith.constant 0 : i32
    return %c0_i32, %c0_i32_0 : i32, i32
  }
  func.func @transform_12(%arg0: i32, %arg1: i32, %arg2: memref<2xi32, #tpu.memory_space<smem>>, %arg3: memref<2xi32, #tpu.memory_space<smem>>) -> (i32, i32) {
    %c0_i32 = arith.constant 0 : i32
    %c0_i32_0 = arith.constant 0 : i32
    %c0_i32_1 = arith.constant 0 : i32
    return %c0_i32, %c0_i32_0 : i32, i32
  }
  func.func @transform_13(%arg0: i32, %arg1: i32, %arg2: memref<2xi32, #tpu.memory_space<smem>>, %arg3: memref<2xi32, #tpu.memory_space<smem>>) -> (i32, i32) {
    %c0_i32 = arith.constant 0 : i32
    %c0_i32_0 = arith.constant 0 : i32
    %c0_i32_1 = arith.constant 0 : i32
    return %c0_i32, %c0_i32_0 : i32, i32
  }
  func.func @transform_14(%arg0: i32, %arg1: i32, %arg2: memref<2xi32, #tpu.memory_space<smem>>, %arg3: memref<2xi32, #tpu.memory_space<smem>>) -> (i32, i32) {
    %c0_i32 = arith.constant 0 : i32
    %c0_i32_0 = arith.constant 0 : i32
    %c0_i32_1 = arith.constant 0 : i32
    return %c0_i32, %c0_i32_0 : i32, i32
  }
  func.func @transform_15(%arg0: i32, %arg1: i32, %arg2: memref<2xi32, #tpu.memory_space<smem>>, %arg3: memref<2xi32, #tpu.memory_space<smem>>) -> (i32, i32) {
    %c0_i32 = arith.constant 0 : i32
    %c0_i32_0 = arith.constant 0 : i32
    %c0_i32_1 = arith.constant 0 : i32
    return %c0_i32, %c0_i32_0 : i32, i32
  }
  func.func @transform_16(%arg0: i32, %arg1: i32, %arg2: memref<2xi32, #tpu.memory_space<smem>>, %arg3: memref<2xi32, #tpu.memory_space<smem>>) -> (i32, i32, i32) {
    %c0_i32 = arith.constant 0 : i32
    %c0_i32_0 = arith.constant 0 : i32
    return %arg0, %arg1, %c0_i32 : i32, i32, i32
  }
}

</mosaic_0001>

<bundles_post_ra>
// kernel: tpu_custom_call.1
= control target key start
LH: loop header
LB: loop body
LE: loop exit
PB: predicated region body
PF: predicated region fallthrough
CT: control target
= control target key end

     0   :  { %s2739_s0 = inlined_call_operand.hbm [shape: s32[2], index: 0, kind: input, shape index: {}]   ;;  %s2740_s2 = inlined_call_operand.hbm [shape: bf16[2,8,128], index: 2, kind: input, shape index: {}]   ;;  %s2741_s3 = inlined_call_operand.vmem [shape: bf16[2,8,128], index: 3, kind: input, shape index: {}]   ;;  %s2742_s4 = inlined_call_operand.vmem [shape: bf16[8,128], index: 4, kind: input, shape index: {}]   ;;  %s2743_s5 = inlined_call_operand.hbm [shape: bf16[128,128], index: 5, kind: input, shape index: {}]   ;;  %s2744_s6 = inlined_call_operand.vmem [shape: bf16[1,128], index: 6, kind: input, shape index: {}]   ;;  %s2745_s7 = inlined_call_operand.hbm [shape: bf16[128,128], index: 7, kind: input, shape index: {}]   ;;  %s2746_s8 = inlined_call_operand.vmem [shape: bf16[1,128], index: 8, kind: input, shape index: {}]   ;;  %s2747_s9 = inlined_call_operand.vmem [shape: bf16[1,128], index: 9, kind: input, shape index: {}]   ;;  %s2748_s10 = inlined_call_operand.vmem [shape: bf16[1,128], index: 10, kind: input, shape index: {}]   ;;  %s2749_s11 = inlined_call_operand.hbm [shape: bf16[128,128], index: 11, kind: input, shape index: {}]   ;;  %s2750_s12 = inlined_call_operand.vmem [shape: bf16[1,128], index: 12, kind: input, shape index: {}]   ;;  %s2751_s13 = inlined_call_operand.vmem [shape: bf16[1,128], index: 13, kind: input, shape index: {}]   ;;  %s2752_s14 = inlined_call_operand.vmem [shape: bf16[1,128], index: 14, kind: input, shape index: {}]   ;;  %s2753_s15 = inlined_call_operand.hbm [shape: bf16[128,128], index: 15, kind: input, shape index: {}]   ;;  %s2754_s16 = inlined_call_operand.hbm [shape: bf16[128,128], index: 16, kind: input, shape index: {}]   ;;  %s2755_s17 = inlined_call_operand.vmem [shape: bf16[1,128], index: 17, kind: input, shape index: {}]   ;;  %s2756_s18 = inlined_call_operand.hbm [shape: bf16[2,8,128], index: 18, kind: output, shape index: {}]   ;;  %s2757_s1 = inlined_call_operand.vmem [shape: s32[2], index: 1, kind: input, shape index: {}]  }
   0x1   :  { %2767 = sst [smem:[#allocation23_spill]] %s2739_s0 }
   0x2   :  { %2768 = sst [smem:[#allocation24_spill]] %s2740_s2  ;;  %s2780_s29 = sld [smem:[#allocation23_spill]] }
   0x3   :  { %2769 = sst [smem:[#allocation25_spill]] %s2741_s3 }
   0x4   :  { %2770 = sst [smem:[#allocation26_spill]] %s2742_s4 }
   0x5   :  { %2771 = sst [smem:[#allocation27_spill]] %s2743_s5 }
   0x6   :  { %2772 = sst [smem:[#allocation28_spill]] %s2745_s7 }
   0x7   :  { %2773 = sst [smem:[#allocation29_spill]] %s2747_s9 }
   0x8   :  { %2774 = sst [smem:[#allocation30_spill]] %s2748_s10  ;;  %s1876_s4 = scalar_lea.hbm %s2780_s29, 16 }
   0x9   :  { %2775 = sst [smem:[#allocation31_spill]] %s2750_s12  ;;  %p1877_p0 = scmp.ne.s32.totalorder %s2780_s29, %s1876_s4 }
   0xa   :  { %2776 = sst [smem:[#allocation32_spill]] %s2751_s13  ;;  %p1880_p1 = scmp.lt.u32.totalorder %s1876_s4, %s2780_s29 }
   0xb   :  { %2777 = sst [smem:[#allocation33_spill]] %s2752_s14 }
   0xc   :  { %2778 = sst [smem:[#allocation34_spill]] %s2755_s17  ;;  %p1882_p2 = pnand %p1880_p1, %p1877_p0 }
   0xd   :  { %2779 = sst [smem:[#allocation35_spill]] %s2756_s18 }
   0xe   :  { %1885 = shalt.err (!%p1882_p2)  }
   0xf   :  { %s2166_s20 = smov [#allocation3]   ;;  %s25_s24 = sshll.u32 %s2757_s1, 4  ;;  %s26_s24 = int_to_ptr.vmem [resolvable:$true] %s25_s24 }
  0x10   :  { %24 = dma.hbm_to_smem %s2780_s29, 16, %s2166_s20, [#allocation2] }
  0x11   :  { %s1886_s25 = scalar_lea.vmem %s26_s24, 16  ;;  %p1891_p4 = scmp.lt.s32.totalorder %s26_s24, %s26_s24 }
  0x12   :  { %p1887_p3 = scmp.ne.s32.totalorder %s26_s24, %s1886_s25  ;;  %p1892_p5 = scmp.lt.s32.totalorder %s1886_s25, %s1886_s25 }
  0x14   :  { %p1893_p6 = por %p1892_p5, %p1891_p4 }
  0x16   :  { %p1894_p7 = pnand %p1893_p6, %p1887_p3 }
  0x18   :  { %1897 = shalt.err (!%p1894_p7)  }
  0x19   :  { %s2167_s4 = smov [#allocation4]  }
  0x1a   :  { %28 = dma.vmem_to_smem %s26_s24, 16, %s2167_s4, [#allocation2] }
  0x1b   :  { %2120 = dma.done.wait [#allocation2], 32 }
  0x1c   :  { %2121 = vsyncadd [#allocation2], 4294967264 }
  0x1d   :  { %30 = sfence }
  0x1e   :  { %31 = vsyncpa [#allocation6], 0 }
  0x1f   :  { %33 = vsyncpa [#allocation6 + $0x1], 0 }
  0x20   :  { %34 = vsyncpa [#allocation9], 0 }
  0x21   :  { %35 = vsyncpa [#allocation12], 0 }
  0x22   :  { %36 = vsyncpa [#allocation15], 0 }
  0x23   :  { %37 = vsyncpa [#allocation7], 0 }
  0x24   :  { %39 = vsyncpa [#allocation7 + $0x1], 0  ;;  %s2289_s1 = smov 0   ;;  %s2291_s26 = smov 0  }
  0x25   :  { %s2293_s27 = smov 0   ;;  %s2295_s28 = smov 0  }
  0x26   :  { %s2297_s29 = smov 0   ;;  %s2299_s30 = smov 0  }
  0x27 LB: > { %s2760_s0 = sadd.s32 4294967295, %s2164_s30   ;;  %p1498_p8 = scmp.ge.s32.totalorder %s2164_s30, 1  ;;  %s2164_s30 = sphi %s2299_s30, %s45_s30   ;;  %s2160_s29 = sphi %s2297_s29, %s2814_s29   ;;  %s2156_s28 = sphi %s2295_s28, %s2813_s28   ;;  %s2152_s27 = sphi %s2293_s27, %s2812_s27   ;;  %s2148_s26 = sphi %s2291_s26, %s2811_s26   ;;  %s2144_s1 = sphi %s2289_s1, %s2810_s1  }
  0x28   : > { %p2323_p9 = scmp.eq.s32.totalorder %s2760_s0, 0  ;;  %p445_p10 = scmp.lt.s32.totalorder %s2164_s30, 3 }
  0x29   : > { %s2168_s20 = smov [#allocation8]   ;;  %s2169_s3 = smov [#allocation11]  }
  0x2a   : > { %s2781_s19 = scalar_select %p2323_p9, 1, 0 }
  0x2b   : > { %p2328_p11 = pnand %p1498_p8, %p445_p10  ;;  %s464_s21 = sshll.u32 %s2168_s20, 4  ;;  %s2332_s21 = int_to_ptr.vmem [resolvable:$true] %s464_s21 }
  0x2c   : > { %s502_s23 = sshll.u32 %s2169_s3, 4  ;;  %s2170_s24 = smov [#allocation10]   ;;  %s2343_s23 = int_to_ptr.vmem [resolvable:$true] %s502_s23 }
  0x2d   : > { %s2782_s2 = scalar_select %p2328_p11, 1, 0 }
  0x2e   : > { %p1733_p12 = pneg %p2328_p11  ;;  %s2345_s25 = sshll.u32 %s2170_s24, 4  ;;  %s481_s25 = int_to_ptr.vmem [resolvable:$true] %s2345_s25 }
  0x2f   : > { %s2784_s5 = sld [smem:[#allocation27_spill]] }
  0x30   : > { %p2339_p0 = pnand %p1733_p12, %p2323_p9 }
  0x32   : > { %p2355_p2 = pneg %p2339_p0 }
  0x35   : > { %s1898_s0 = scalar_lea.hbm %s2784_s5, 1024 }
  0x36   : > { %p1899_p1 = scmp.ne.s32.totalorder %s2784_s5, %s1898_s0  ;;  %p1905_p5 = scmp.lt.u32.totalorder %s1898_s0, %s2784_s5 }
  0x38   : > { %p1901_p3 = pnand %p2355_p2, %p1899_p1 }
  0x3a   : > { %p1902_p4 = pneg %p1901_p3 }
  0x3c   : > { %p1907_p6 = pnand %p1905_p5, %p1902_p4 }
  0x3e   : > { %1910 = shalt.err (!%p1907_p6)
}
  0x3f   : > { %s1911_s17 = scalar_lea.vmem %s2332_s21, 1024  ;;  %p1919_p12 = scmp.lt.s32.totalorder %s2332_s21, %s2332_s21 }
  0x40   : > { %p1912_p7 = scmp.ne.s32.totalorder %s2332_s21, %s1911_s17  ;;  %p1920_p13 = scmp.lt.s32.totalorder %s1911_s17, %s1911_s17 }
  0x42   : > { %p1914_p8 = pnand %p1912_p7, %p2355_p2  ;;  %p1921_p1 = por %p1920_p13, %p1919_p12 }
  0x44   : > { %p1915_p10 = pneg %p1914_p8 }
  0x46   : > { %p1922_p3 = pnand %p1921_p1, %p1915_p10 }
  0x48   : > { %1925 = shalt.err (!%p1922_p3)
}
  0x49   : > { %s2171_s18 = smov 64   ;;  %s2172_s0 = smov 4  }
  0x4a   : > { %1736 = dma.hbm_to_vmem [thread:$0]  (!%p2339_p0), %s2784_s5, 1024, %s2332_s21, [#allocation9], %s2171_s18, %s2171_s18, %s2172_s0  }
  0x4b   : > { %s1926_s17 = scalar_lea.hbm %s2749_s11, 1024 }
  0x4c   : > { %p1927_p13 = scmp.ne.s32.totalorder %s2749_s11, %s1926_s17  ;;  %p1933_p6 = scmp.lt.u32.totalorder %s1926_s17, %s2749_s11 }
  0x4e   : > { %p1929_p4 = pnand %p1927_p13, %p2355_p2 }
  0x50   : > { %p1930_p5 = pneg %p1929_p4 }
  0x52   : > { %p1935_p7 = pnand %p1933_p6, %p1930_p5 }
  0x54   : > { %1938 = shalt.err (!%p1935_p7)
}
  0x55   : > { %s1939_s21 = scalar_lea.vmem %s2343_s23, 1024  ;;  %p1947_p1 = scmp.lt.s32.totalorder %s2343_s23, %s2343_s23 }
  0x56   : > { %p1940_p8 = scmp.ne.s32.totalorder %s2343_s23, %s1939_s21  ;;  %p1948_p3 = scmp.lt.s32.totalorder %s1939_s21, %s1939_s21 }
  0x58   : > { %p1942_p10 = pnand %p1940_p8, %p2355_p2  ;;  %p1949_p13 = por %p1948_p3, %p1947_p1 }
  0x5a   : > { %p1943_p12 = pneg %p1942_p10 }
  0x5c   : > { %p1950_p4 = pnand %p1949_p13, %p1943_p12 }
  0x5e   : > { %1953 = shalt.err (!%p1950_p4)
}
  0x5f   : > { %1742 = dma.hbm_to_vmem [thread:$0]  (!%p2339_p0), %s2749_s11, 1024, %s2343_s23, [#allocation12], %s2171_s18, %s2171_s18, %s2172_s0  }
  0x60   : > { %s2786_s7 = sld [smem:[#allocation28_spill]] }
  0x66   : > { %s1954_s4 = scalar_lea.hbm %s2786_s7, 1024 }
  0x67   : > { %p1955_p5 = scmp.ne.s32.totalorder %s2786_s7, %s1954_s4  ;;  %p1961_p8 = scmp.lt.u32.totalorder %s1954_s4, %s2786_s7 }
  0x69   : > { %p1957_p6 = pnand %p1955_p5, %p2355_p2 }
  0x6b   : > { %p1958_p7 = pneg %p1957_p6 }
  0x6d   : > { %p1963_p10 = pnand %p1961_p8, %p1958_p7 }
  0x6f   : > { %1966 = shalt.err (!%p1963_p10)
}
  0x70   : > { %s1967_s21 = scalar_lea.vmem %s481_s25, 1024  ;;  %p1975_p13 = scmp.lt.s32.totalorder %s481_s25, %s481_s25 }
  0x71   : > { %p1968_p12 = scmp.ne.s32.totalorder %s481_s25, %s1967_s21  ;;  %p1976_p4 = scmp.lt.s32.totalorder %s1967_s21, %s1967_s21 }
  0x73   : > { %p1970_p1 = pnand %p1968_p12, %p2355_p2  ;;  %p1977_p11 = por %p1976_p4, %p1975_p13 }
  0x75   : > { %p1971_p3 = pneg %p1970_p1 }
  0x77   : > { %p1978_p9 = pnand %p1977_p11, %p1971_p3 }
  0x79   : > { %1981 = shalt.err (!%p1978_p9)
}
  0x7a   : > { %1739 = dma.hbm_to_vmem [thread:$0]  (!%p2339_p0), %s2786_s7, 1024, %s481_s25, [#allocation9], %s2171_s18, %s2171_s18, %s2172_s0  }
  0x7b   : > { %s2173_s10 = smov [#allocation13]   ;;  %s2174_s13 = smov [#allocation14]  }
  0x7c   : > { %s524_s12 = sshll.u32 %s2173_s10, 4  ;;  %s537_s4 = sshll.u32 %s2174_s13, 4  ;;  %s525_s12 = int_to_ptr.vmem [resolvable:$true] %s524_s12  ;;  %s538_s4 = int_to_ptr.vmem [resolvable:$true] %s537_s4 }
  0x7d   : > { %s1982_s24 = scalar_lea.hbm %s2753_s15, 1024 }
  0x7e   : > { %p1983_p9 = scmp.ne.s32.totalorder %s2753_s15, %s1982_s24  ;;  %p1989_p6 = scmp.lt.u32.totalorder %s1982_s24, %s2753_s15 }
  0x80   : > { %p1985_p11 = pnand %p1983_p9, %p2355_p2 }
  0x82   : > { %p1986_p5 = pneg %p1985_p11 }
  0x84   : > { %p1991_p7 = pnand %p1989_p6, %p1986_p5 }
  0x86   : > { %1994 = shalt.err (!%p1991_p7)
}
  0x87   : > { %s1995_s25 = scalar_lea.vmem %s525_s12, 1024  ;;  %p2003_p1 = scmp.lt.s32.totalorder %s525_s12, %s525_s12 }
  0x88   : > { %p1996_p8 = scmp.ne.s32.totalorder %s525_s12, %s1995_s25  ;;  %p2004_p3 = scmp.lt.s32.totalorder %s1995_s25, %s1995_s25 }
  0x8a   : > { %p1998_p10 = pnand %p1996_p8, %p2355_p2  ;;  %p2005_p13 = por %p2004_p3, %p2003_p1 }
  0x8c   : > { %p1999_p12 = pneg %p1998_p10 }
  0x8e   : > { %p2006_p4 = pnand %p2005_p13, %p1999_p12 }
  0x90   : > { %2009 = shalt.err (!%p2006_p4)
}
  0x91   : > { %1745 = dma.hbm_to_vmem [thread:$0]  (!%p2339_p0), %s2753_s15, 1024, %s525_s12, [#allocation12], %s2171_s18, %s2171_s18, %s2172_s0  }
  0x92   : > { %s2010_s20 = scalar_lea.hbm %s2754_s16, 1024 }
  0x93   : > { %p2011_p9 = scmp.ne.s32.totalorder %s2754_s16, %s2010_s20  ;;  %p2017_p6 = scmp.lt.u32.totalorder %s2010_s20, %s2754_s16 }
  0x95   : > { %p2013_p11 = pnand %p2011_p9, %p2355_p2 }
  0x97   : > { %p2014_p5 = pneg %p2013_p11 }
  0x99   : > { %p2019_p7 = pnand %p2017_p6, %p2014_p5 }
  0x9b   : > { %2022 = shalt.err (!%p2019_p7)
}
  0x9c   : > { %s2023_s23 = scalar_lea.vmem %s538_s4, 1024  ;;  %p2031_p1 = scmp.lt.s32.totalorder %s538_s4, %s538_s4 }
  0x9d   : > { %p2024_p8 = scmp.ne.s32.totalorder %s538_s4, %s2023_s23  ;;  %p2032_p3 = scmp.lt.s32.totalorder %s2023_s23, %s2023_s23 }
  0x9f   : > { %p2026_p10 = pnand %p2024_p8, %p2355_p2  ;;  %p2033_p13 = por %p2032_p3, %p2031_p1 }
  0xa1   : > { %p2027_p12 = pneg %p2026_p10 }
  0xa3   : > { %p2034_p4 = pnand %p2033_p13, %p2027_p12 }
  0xa5   : > { %2037 = shalt.err (!%p2034_p4)
}
  0xa6   : > { %1748 = dma.hbm_to_vmem [thread:$0]  (!%p2339_p0), %s2754_s16, 1024, %s538_s4, [#allocation15], %s2171_s18, %s2171_s18, %s2172_s0  }
  0xa7   : > { %s1497_s14 = sadd.s32 4294967294, %s2164_s30   ;;  %s57_s22 = sadd.s32 1, %s2160_s29 }
  0xa8   : > { %s66_s5 = sadd.s32 1, %s2152_s27  ;;  %p59_p2 = scmp.ge.s32.totalorder %s57_s22, 2 }
  0xa9   : > { %p73_p9 = scmp.ne.s32.totalorder %s2152_s27, %s2148_s26  ;;  %p74_p11 = scmp.eq.s32.totalorder %s2164_s30, 0 }
  0xaa   : > { %p79_p5 = scmp.ne.s32.totalorder %s2148_s26, %s2144_s1  ;;  %s2816_s22 = smov (%p59_p2, %s57_s22), 0 }
  0xab   : > { %p2479_p6 = por %p74_p11, %p73_p9  ;;  %p2788_p7 = scmp.ne.s32.totalorder %s2781_s19, 0 }
  0xac   : > { %s61_s0 = ssub.s32 %s2160_s29, %s2816_s22  ;;  %s2790_s4 = sadd.s32 4294967295, %s2164_s30  }
  0xad   : > { %p2485_p0 = por %p2788_p7, %p79_p5  ;;  %p432_p8 = scmp.eq.s32.totalorder %s2790_s4, 1 }
  0xae   : > { %p64_p10 = scmp.eq.s32.totalorder %s61_s0, 0  ;;  %p438_p12 = scmp.eq.s32.totalorder %s1497_s14, 1 }
  0xaf   : > { %p2493_p1 = por %p432_p8, %p73_p9  ;;  %p1762_p3 = scmp.lt.s32.totalorder %s2164_s30, 2 }
  0xb0   : > { %s2499_s13 = scalar_select %p64_p10, %s2152_s27, %s66_s5  }
  0xb1   : > { %s2791_s10 = scalar_select %p2493_p1, 1, 0 }
  0xb2   : > { %p2501_p13 = por %p438_p12, %p79_p5  ;;  %s554_s3 = sand.u32 1, %s2152_s27  }
  0xb3   : > { %s1506_s24 = sshll.u32 %s554_s3, 2  ;;  %s1507_s17 = sshll.u32 %s2160_s29, 6 }
  0xb4   : > { %s2792_s20 = scalar_select %p2501_p13, 1, 0 }
  0xb5   : > { %s2793_s12 = sld [smem:[#allocation24_spill]]  ;;  %s558_s14 = scalar_lea.vmem [#allocation5], %s1506_s24 }
  0xb6   : > { %s566_s0 = sshll.u32 %s558_s14, 4  ;;  %p2516_p4 = pnand %p1762_p3, %p2479_p6  ;;  %s2512_s0 = int_to_ptr.vmem [resolvable:$true] %s566_s0 }
  0xb7   : > { %s555_s4 = scalar_lea.sflag [#allocation6], %s554_s3 }
  0xb8   : > { %p2040_p9 = pneg %p2516_p4 }
  0xbb   : > { %s2510_s25 = scalar_lea.hbm %s2793_s12, %s1507_s17  ;;  %s2043_s21 = scalar_lea.hbm %s2793_s12, 128 }
  0xbc   : > { %s2038_s7 = scalar_lea.hbm %s2510_s25, 64  ;;  %p2044_p6 = scmp.lt.u32.totalorder %s2510_s25, %s2793_s12 }
  0xbd   : > { %p2039_p2 = scmp.ne.s32.totalorder %s2510_s25, %s2038_s7  ;;  %p2045_p7 = scmp.lt.u32.totalorder %s2043_s21, %s2038_s7 }
  0xbe   : > { %p2047_p10 = scmp.lt.u32.totalorder %s2038_s7, %s2510_s25 }
  0xbf   : > { %p2041_p11 = pnand %p2040_p9, %p2039_p2  ;;  %p2046_p8 = por %p2045_p7, %p2044_p6 }
  0xc1   : > { %p2042_p5 = pneg %p2041_p11  ;;  %p2048_p12 = por %p2047_p10, %p2046_p8 }
  0xc3   : > { %p2049_p3 = pnand %p2048_p12, %p2042_p5 }
  0xc5   : > { %2052 = shalt.err (!%p2049_p3)
}
  0xc6   : > { %s2053_s3 = scalar_lea.vmem %s2512_s0, 64  ;;  %s2175_s14 = smov [#allocation5]  }
  0xc7   : > { %p2054_p2 = scmp.ne.s32.totalorder %s2512_s0, %s2053_s3  ;;  %s2058_s24 = sshll.u32 %s2175_s14, 4  ;;  %s2059_s24 = int_to_ptr.vmem [resolvable:$false] %s2058_s24 }
  0xc8   : > { %s2060_s17 = scalar_lea.vmem %s2059_s24, 128  ;;  %p2061_p1 = scmp.lt.s32.totalorder %s2512_s0, %s2059_s24 }
  0xc9   : > { %p2056_p11 = pnand %p2054_p2, %p2040_p9  ;;  %p2062_p6 = scmp.lt.s32.totalorder %s2060_s17, %s2053_s3 }
  0xcb   : > { %p2057_p13 = pneg %p2056_p11  ;;  %p2063_p7 = por %p2062_p6, %p2061_p1 }
  0xcd   : > { %p2064_p8 = pnand %p2063_p7, %p2057_p13 }
  0xcf   : > { %2067 = shalt.err (!%p2064_p8)
}
  0xd0   : > { %1752 = dma.hbm_to_vmem [thread:$0]  (!%p2516_p4), %s2510_s25, 64, %s2512_s0, %s555_s4  }
  0xd1   : > { %p2795_p5 = scmp.ne.s32.totalorder %s2782_s2, 0 }
  0xd2   : > { %s2548_s7 = sand.u32 (!%p2795_p5), 1, %s2148_s26  }
  0xd3   : > { %585 = sbr.rel (%p2795_p5) target bundleno = 1280 (0x500), region = 84  ;;  %s2766_s21 = sshll.u32 (!%p2795_p5), %s2548_s7, 2 }
  0xd4   : > { %s588_s9 = scalar_lea.sflag (!%p2795_p5), [#allocation6], %s2548_s7  ;;  %s2554_s23 = scalar_lea.vmem (!%p2795_p5), [#allocation5], %s2766_s21 }
  0xda   : > { %2123 = dma.done.wait (%p2485_p0), %s588_s9, 64  }
  0xdb   : > { %2125 = vsyncadd (%p2485_p0), %s588_s9, 4294967232  ;;  %p2796_p1 = scmp.ne.s32.totalorder %s2781_s19, 0 }
  0xdd   : > { %2127 = dma.done.wait (%p2796_p1), [#allocation9], 2048  }
  0xde   : > { %2129 = vsyncadd (%p2796_p1), [#allocation9], 4294965248 }
  0xdf   : > { %2131 = dma.done.wait (%p2796_p1), [#allocation12], 2048  }
  0xe0   : > { %2133 = vsyncadd (%p2796_p1), [#allocation12], 4294965248 }
  0xe1   : > { %2135 = dma.done.wait (%p2796_p1), [#allocation15], 1024  }
  0xe2   : > { %2137 = vsyncadd (%p2796_p1), [#allocation15], 4294966272  ;;  %v2176_v0 = vmov 0.0   ;;  %vm2177_vm0 = vmmov 0   ;;  %v1828_v1 = vld [vmem:[#allocation8] sm:$0xff]   ;;  %v1829_v2 = vld [vmem:[#allocation8 + $0x8] sm:$0xff]   ;;  %v684_v27 = vlaneseq }
  0xe3   : > { %1609 = vmatprep.subr.bf16.mxu0 %v2176_v0  ;;  %1625 = vmatprep.mubr.msk.bf16.mxu0 %vm2177_vm0, %v2176_v0  ;;  %v1830_v3 = vld [vmem:[#allocation8 + $0x10] sm:$0xff]   ;;  %v1836_v4 = vld [vmem:[#allocation10] sm:$0xff]   ;;  %v1831_v5 = vld [vmem:[#allocation8 + $0x18] sm:$0xff]   ;;  %p671_p0 = scmp.lt.s32.totalorder %s2156_s28, 1  ;;  %s2797_s0 = sld [smem:[#allocation25_spill]] }
  0xe4   : > { %1629 = vmatprep.subr.bf16.mxu1 %v2176_v0  ;;  %1645 = vmatprep.mubr.msk.bf16.mxu1 %vm2177_vm0, %v2176_v0  ;;  %v1838_v6 = vld [vmem:[#allocation10 + $0x8] sm:$0xff]   ;;  %v1832_v7 = vld [vmem:[#allocation8 + $0x20] sm:$0xff]   ;;  %v1840_v8 = vld [vmem:[#allocation10 + $0x10] sm:$0xff]   ;;  %v2612_v28 = vshrl.u32 %v684_v27, 7  ;;  %v699_v56 = vand.u32 127, %v684_v27  ;;  %s2799_s18 = sld [smem:[#allocation29_spill]] }
  0xe5   : > { %1610 = vmatpush3.bf16.msra.mxu0 %v1828_v1  ;;  %1630 = vmatpush3.bf16.msra.mxu1 %v1836_v4  ;;  %v1833_v9 = vld [vmem:[#allocation8 + $0x28] sm:$0xff]   ;;  %v1842_v10 = vld [vmem:[#allocation10 + $0x18] sm:$0xff]   ;;  %v1834_v11 = vld [vmem:[#allocation8 + $0x30] sm:$0xff]   ;;  %s672_s19 = scalar_select %p671_p0, %s2156_s28, 1 }
  0xe6   : > { %1611 = vmatprep.subr.bf16.mxu0 %v2176_v0  ;;  %1631 = vmatprep.subr.bf16.mxu1 %v2176_v0  ;;  %v1844_v12 = vld [vmem:[#allocation10 + $0x20] sm:$0xff]   ;;  %v1835_v13 = vld [vmem:[#allocation8 + $0x38] sm:$0xff]   ;;  %v1846_v14 = vld [vmem:[#allocation10 + $0x28] sm:$0xff]   ;;  %v2618_v31 = vsub.s32 0, %v2612_v28  ;;  %vm700_vm1 = vcmp.lt.s32.totalorder %v699_v56, 32  ;;  %s688_s25 = sld [smem:[#allocation3 + %s2156_s28]] }
  0xe7   : > { %v703_v15 = vld [vmem:[%s2554_s23] sm:$0xf]  ;;  %v1837_v16 = vld [vmem:[#allocation11] sm:$0xff]   ;;  %v1848_v17 = vld [vmem:[#allocation10 + $0x30] sm:$0xff]   ;;  %s1516_s2 = sshll.u32 %s672_s19, 2  ;;  %s2798_s23 = sld [smem:[#allocation31_spill]] }
  0xe8   : > { %v1839_v18 = vld [vmem:[#allocation11 + $0x8] sm:$0xff]   ;;  %v1841_v19 = vld [vmem:[#allocation11 + $0x10] sm:$0xff]   ;;  %v1843_v20 = vld [vmem:[#allocation11 + $0x18] sm:$0xff]   ;;  %s2800_s4 = sld [smem:[#allocation30_spill]]  ;;  %s2801_s24 = sld [smem:[#allocation32_spill]] }
  0xe9   : > { %1612 = vmatpush3.bf16.msra.mxu0 %v1829_v2  ;;  %1632 = vmatpush3.bf16.msra.mxu1 %v1838_v6  ;;  %v1845_v21 = vld [vmem:[#allocation11 + $0x20] sm:$0xff]   ;;  %v1847_v22 = vld [vmem:[#allocation11 + $0x28] sm:$0xff]   ;;  %v1849_v23 = vld [vmem:[#allocation11 + $0x30] sm:$0xff]   ;;  %s677_s5 = scalar_lea.vmem %s2797_s0, %s1516_s2  ;;  %s693_s17 = sld [smem:[#allocation4 + %s2156_s28]] }
  0xea   : > { %1613 = vmatprep.subr.bf16.mxu0 %v2176_v0  ;;  %1633 = vmatprep.subr.bf16.mxu1 %v2176_v0  ;;  %v1850_v24 = vld [vmem:[#allocation10 + $0x38] sm:$0xff]   ;;  %v952_v26 = vld [vmem:[%s677_s5] sm:$0xf]  ;;  %v1852_v55 = vld [vmem:[#allocation13] sm:$0xff]   ;;  %s2802_s21 = sld [smem:[#allocation33_spill]]  ;;  %s2804_s0 = sld [smem:[#allocation34_spill]] }
  0xeb   : > { %v1851_v25 = vld [vmem:[#allocation11 + $0x38] sm:$0xff]   ;;  %v720_v29 = vld [vmem:[%s2744_s6] sm:$0x1]  ;;  %v1853_v4 = vld [vmem:[#allocation14] sm:$0xff]   ;;  %s1561_s5 = sshll.u32 %s2156_s28, 6  ;;  %s2806_s9 = sld [smem:[#allocation35_spill]] }
  0xec   : > { %v721_v30 = vunpack.c.l.bf16 %v720_v29  ;;  %v831_v43 = vld [vmem:[%s2746_s8] sm:$0x1]  ;;  %s1324_s19 = scalar_lea.sflag [#allocation7], %s2548_s7  ;;  %p2807_p4 = scmp.ne.s32.totalorder %s2791_s10, 0 }
  0xed   : > { %1614 = vmatpush3.bf16.msra.mxu0 %v1830_v3  ;;  %1634 = vmatpush3.bf16.msra.mxu1 %v1840_v8  ;;  %v969_v44 = vld [vmem:[%s2798_s23] sm:$0x1]  ;;  %v832_v45 = vunpack.c.l.bf16 %v831_v43  ;;  %v1857_v8 = vld [vmem:[#allocation14 + $0x10] sm:$0xff]   ;;  %s2178_s28 = smov [#allocation16]  }
  0xee   : > { %1615 = vmatprep.subr.bf16.mxu0 %v2176_v0  ;;  %1635 = vmatprep.subr.bf16.mxu1 %v2176_v0  ;;  %v725_v32 = vrot.slane %v721_v30, %v2618_v31  ;;  %v970_v46 = vunpack.c.l.bf16 %v969_v44  ;;  %v1855_v6 = vld [vmem:[#allocation14 + $0x8] sm:$0xff]  }
  0xef   : > { %v836_v47 = vrot.slane %v832_v45, %v2618_v31  ;;  %v1075_v29 = vld [vmem:[%s2801_s24] sm:$0x1]  ;;  %v694_v45 = vstv %s693_s17 }
  0xf0   : > { %v974_v48 = vrot.slane %v970_v46, %v2618_v31  ;;  %vm695_vm3 = vcmp.lt.s32.totalorder %v2612_v28, %v694_v45 }
  0xf1   : > { %1616 = vmatpush3.bf16.msra.mxu0 %v1831_v5  ;;  %1636 = vmatpush3.bf16.msra.mxu1 %v1842_v10  ;;  %v1854_v5 = vld [vmem:[#allocation13 + $0x8] sm:$0xff]   ;;  %v1859_v10 = vld [vmem:[#allocation14 + $0x18] sm:$0xff]   ;;  %s2690_s23 = scalar_lea.hbm %s2806_s9, %s1561_s5 }
  0xf2   : > { %1617 = vmatprep.subr.bf16.mxu0 %v2176_v0  ;;  %1637 = vmatprep.subr.bf16.mxu1 %v2176_v0 }
  0xf5   : > { %1618 = vmatpush3.bf16.msra.mxu0 %v1832_v7  ;;  %1638 = vmatpush3.bf16.msra.mxu1 %v1844_v12  ;;  %v1856_v7 = vld [vmem:[#allocation13 + $0x10] sm:$0xff]   ;;  %v1861_v12 = vld [vmem:[#allocation14 + $0x20] sm:$0xff]  }
  0xf6   : > { %1619 = vmatprep.subr.bf16.mxu0 %v2176_v0  ;;  %1639 = vmatprep.subr.bf16.mxu1 %v2176_v0 }
  0xf9   : > { %1620 = vmatpush3.bf16.msra.mxu0 %v1833_v9  ;;  %1640 = vmatpush3.bf16.msra.mxu1 %v1846_v14  ;;  %v1858_v9 = vld [vmem:[#allocation13 + $0x18] sm:$0xff]   ;;  %v1863_v14 = vld [vmem:[#allocation14 + $0x28] sm:$0xff]  }
  0xfa   : > { %1621 = vmatprep.subr.bf16.mxu0 %v2176_v0  ;;  %1641 = vmatprep.subr.bf16.mxu1 %v2176_v0 }
  0xfd   : > { %1622 = vmatpush3.bf16.msra.mxu0 %v1834_v11  ;;  %1642 = vmatpush3.bf16.msra.mxu1 %v1848_v17  ;;  %v1860_v11 = vld [vmem:[#allocation13 + $0x20] sm:$0xff]   ;;  %v1866_v17 = vld [vmem:[#allocation13 + $0x38] sm:$0xff]  }
  0xfe   : > { %1623 = vmatprep.subr.bf16.mxu0 %v2176_v0  ;;  %1643 = vmatprep.subr.bf16.mxu1 %v2176_v0 }
 0x101   : > { %1624 = vmatpush3.bf16.msra.mxu0 %v1835_v13  ;;  %1644 = vmatpush3.bf16.msra.mxu1 %v1850_v24  ;;  %v1862_v13 = vld [vmem:[#allocation13 + $0x28] sm:$0xff]  }
 0x102   : > { %1649 = vmatprep.subr.bf16.mxu0 %v2176_v0  ;;  %1669 = vmatprep.subr.bf16.mxu1 %v2176_v0  ;;  %v937_v24 = vld [vmem:[%s2799_s18] sm:$0x1]  ;;  %s2803_s18 = sld [smem:[#allocation26_spill]] }
 0x103   : > { %v938_v27 = vunpack.c.l.bf16 %v937_v24 }
 0x104   : > { %1626 = vmatmul.mubr.bf16.vlgmr.msra.gmra.mrb[0].mxu0 %v703_v15  ;;  %v1864_v15 = vld [vmem:[#allocation13 + $0x30] sm:$0xff]  }
 0x105   : > { %1650 = vmatpush3.bf16.msra.mxu0 %v1837_v16  ;;  %1665 = vmatprep.mubr.msk.bf16.mxu0 %vm2177_vm0, %v2176_v0  ;;  %v1865_v16 = vld [vmem:[#allocation14 + $0x30] sm:$0xff]  }
 0x106   : > { %1651 = vmatprep.subr.bf16.mxu0 %v2176_v0 }
 0x109   : > { %1652 = vmatpush3.bf16.msra.mxu0 %v1839_v18  ;;  %v1867_v18 = vld [vmem:[#allocation14 + $0x38] sm:$0xff]  }
 0x10a   : > { %1653 = vmatprep.subr.bf16.mxu0 %v2176_v0 }
 0x10d   : > { %1654 = vmatpush3.bf16.msra.mxu0 %v1841_v19 }
 0x10e   : > { %1655 = vmatprep.subr.bf16.mxu0 %v2176_v0 }
 0x111   : > { %1656 = vmatpush3.bf16.msra.mxu0 %v1843_v20 }
 0x112   : > { %1657 = vmatprep.subr.bf16.mxu0 %v2176_v0 }
 0x115   : > { %1658 = vmatpush3.bf16.msra.mxu0 %v1845_v21 }
 0x116   : > { %1659 = vmatprep.subr.bf16.mxu0 %v2176_v0 }
 0x119   : > { %1660 = vmatpush3.bf16.msra.mxu0 %v1847_v22 }
 0x11a   : > { %1661 = vmatprep.subr.bf16.mxu0 %v2176_v0 }
 0x11d   : > { %1662 = vmatpush3.bf16.msra.mxu0 %v1849_v23 }
 0x11e   : > { %1663 = vmatprep.subr.bf16.mxu0 %v2176_v0 }
 0x121   : > { %1664 = vmatpush3.bf16.msra.mxu0 %v1851_v25 }
 0x122   : > { %1689 = vmatprep.subr.bf16.mxu0 %v2176_v0 }
 0x124   : > { %1666 = vmatmul.mubr.bf16.vlgmr.msra.gmra.mrb[4].mxu0 %v952_v26  ;;  %v944_v26 = vld [vmem:[%s2800_s4] sm:$0x1]  ;;  %s2805_s4 = sshll.u32 %s2548_s7, 2 }
 0x125   : > { %1705 = vmatprep.mubr.msk.bf16.mxu0 %vm2177_vm0, %v2176_v0  ;;  %1690 = vmatpush3.bf16.msra.mxu0 %v1852_v55  ;;  %v945_v30 = vunpack.c.l.bf16 %v944_v26  ;;  %s670_s3 = scalar_lea.vmem [#allocation16], %s2805_s4 }
 0x126   : > { %1691 = vmatprep.subr.bf16.mxu0 %v2176_v0  ;;  %s1338_s14 = sshll.u32 %s670_s3, 4  ;;  %s2692_s14 = int_to_ptr.vmem [resolvable:$true] %s1338_s14 }
 0x127   : > { %s2068_s2 = scalar_lea.vmem %s2692_s14, 64 }
 0x128   : > { %p2069_p13 = scmp.ne.s32.totalorder %s2692_s14, %s2068_s2 }
 0x129   : > { %1692 = vmatpush3.bf16.msra.mxu0 %v1854_v5 }
 0x12a   : > { %1693 = vmatprep.subr.bf16.mxu0 %v2176_v0  ;;  %p2070_p9 = pnand %p2069_p13, %p2807_p4 }
 0x12c   : > { %p2071_p10 = pneg %p2070_p9 }
 0x12d   : > { %1694 = vmatpush3.bf16.msra.mxu0 %v1856_v7 }
 0x12e   : > { %1695 = vmatprep.subr.bf16.mxu0 %v2176_v0 }
 0x131   : > { %1696 = vmatpush3.bf16.msra.mxu0 %v1858_v9 }
 0x132   : > { %1697 = vmatprep.subr.bf16.mxu0 %v2176_v0 }
 0x135   : > { %1698 = vmatpush3.bf16.msra.mxu0 %v1860_v11 }
 0x136   : > { %1699 = vmatprep.subr.bf16.mxu0 %v2176_v0 }
 0x139   : > { %1700 = vmatpush3.bf16.msra.mxu0 %v1862_v13 }
 0x13a   : > { %1701 = vmatprep.subr.bf16.mxu0 %v2176_v0 }
 0x13d   : > { %1702 = vmatpush3.bf16.msra.mxu0 %v1864_v15 }
 0x13e   : > { %1703 = vmatprep.subr.bf16.mxu0 %v2176_v0 }
 0x141   : > { %1704 = vmatpush3.bf16.msra.mxu0 %v1866_v17 }
 0x1d7   : > { %v808_v33 = vpop.f32.mrb[0].mxu0 }
 0x1d8   : > { %v809_v34 = vadd.f32 %v808_v33, %v725_v32  ;;  %v1627_v35 = vpop.f32.mrb[1].mxu0  ;;  %v1082_v32 = vld [vmem:[%s2802_s21] sm:$0x1]  ;;  %v942_v33 = vrot.slane %v938_v27, %v2618_v31 }
 0x1d9   : > { %v811_v36 = vpop.f32.mrb[2].mxu0 }
 0x1da   : > { %v814_v37 = vpack.c.bf16 %v809_v34, %v809_v34  ;;  %v1628_v38 = vpop.f32.mrb[3].mxu0  ;;  %v1076_v34 = vunpack.c.l.bf16 %v1075_v29  ;;  %v689_v36 = vstv %s688_s25 }
 0x1db   : > { %vm690_vm2 = vcmp.lt.s32.totalorder %v2612_v28, %v689_v36 }
 0x1dc   : > { %1646 = vmatmul.mubr.bf16.vlgmr.msra.gmra.mrb[0].mxu1 %v814_v37  ;;  %v701_v37 = vld [vmem:[%s2803_s18] sm:$0xf]  ;;  %s2072_s18 = sshll.u32 %s2178_s28, 4  ;;  %s2073_s18 = int_to_ptr.vmem [resolvable:$false] %s2072_s18 }
 0x1dd   : > { %1685 = vmatprep.mubr.msk.bf16.mxu1 %vm2177_vm0, %v2176_v0  ;;  %1670 = vmatpush3.bf16.msra.mxu1 %v1853_v4  ;;  %v702_v43 = vunpack.c.l.bf16 %v701_v37  ;;  %s2074_s21 = scalar_lea.vmem %s2073_s18, 128  ;;  %p2075_p12 = scmp.lt.s32.totalorder %s2692_s14, %s2073_s18 }
 0x1de   : > { %1671 = vmatprep.subr.bf16.mxu1 %v2176_v0  ;;  %p2076_p3 = scmp.lt.s32.totalorder %s2074_s21, %s2068_s2 }
 0x1e0   : > { %p2077_p2 = por %p2076_p3, %p2075_p12 }
 0x1e1   : > { %1672 = vmatpush3.bf16.msra.mxu1 %v1855_v6 }
 0x1e2   : > { %1673 = vmatprep.subr.bf16.mxu1 %v2176_v0  ;;  %p2078_p11 = pnand %p2077_p2, %p2071_p10 }
 0x1e5   : > { %1674 = vmatpush3.bf16.msra.mxu1 %v1857_v8 }
 0x1e6   : > { %1675 = vmatprep.subr.bf16.mxu1 %v2176_v0 }
 0x1e9   : > { %1676 = vmatpush3.bf16.msra.mxu1 %v1859_v10 }
 0x1ea   : > { %1677 = vmatprep.subr.bf16.mxu1 %v2176_v0 }
 0x1ed   : > { %1678 = vmatpush3.bf16.msra.mxu1 %v1861_v12 }
 0x1ee   : > { %1679 = vmatprep.subr.bf16.mxu1 %v2176_v0 }
 0x1f1   : > { %1680 = vmatpush3.bf16.msra.mxu1 %v1863_v14 }
 0x1f2   : > { %1681 = vmatprep.subr.bf16.mxu1 %v2176_v0 }
 0x1f5   : > { %1682 = vmatpush3.bf16.msra.mxu1 %v1865_v16 }
 0x1f6   : > { %1683 = vmatprep.subr.bf16.mxu1 %v2176_v0 }
 0x1f7   : > { %v1057_v39 = vpop.f32.mrb[4].mxu0 }
 0x1f8   : > { %v1667_v40 = vpop.f32.mrb[5].mxu0  ;;  %v1058_v53 = vadd.f32 %v1057_v39, %v974_v48  ;;  %v949_v39 = vrot.slane %v945_v30, %v2618_v31 }
 0x1f9   : > { %v1060_v41 = vpop.f32.mrb[6].mxu0  ;;  %1684 = vmatpush3.bf16.msra.mxu1 %v1867_v18  ;;  %v1083_v40 = vunpack.c.l.bf16 %v1082_v32 }
 0x1fa   : > { %v1668_v42 = vpop.f32.mrb[7].mxu0 }
 0x1fb   : > { %v1080_v42 = vrot.slane %v1076_v34, %v2618_v31  ;;  %v1087_v48 = vrot.slane %v1083_v40, %v2618_v31 }
 0x2af   : > { %v919_v49 = vpop.f32.mrb[0].mxu1 }
 0x2b0   : > { %v920_v50 = vadd.f32 %v919_v49, %v836_v47  ;;  %v1647_v51 = vpop.f32.mrb[1].mxu1  ;;  %v1517_v49 = vsel %vm690_vm2, 1.0, %v2176_v0 }
 0x2b1   : > { %v922_v52 = vpop.f32.mrb[2].mxu1 }
 0x2b2   : > { %925 = vadd.xlane.f32.xlu0 %v920_v50  ;;  %v1648_v54 = vpop.f32.mrb[3].mxu1 }
 0x2b3   : > { %v1518_v54 = vsel %vm695_vm3, 1.0, %v2176_v0 }
 0x2b6   : > { %1063 = vadd.xlane.f32.xlu0 %v1058_v53 }
 0x33f   : > { %v926_v57 = vpop.xlane.xlu0 %925 }
 0x340   : > { %v927_v58 = vmul.f32 0.03125, %v926_v57 }
 0x342   : > { %v928_v59 = vsub.f32 %v920_v50, %v927_v58 }
 0x343   : > { %v1064_v60 = vpop.xlane.xlu0 %1063 }
 0x344   : > { %v1065_v61 = vmul.f32 0.03125, %v1064_v60  ;;  %v2632_v62 = vsel %vm700_vm1, %v928_v59, 0.0  ;;  %v1302_v59 = vld [vmem:[%s2804_s0] sm:$0x1] }
 0x345   : > { %v930_v63 = vmul.f32 %v2632_v62, %v2632_v62  ;;  %v1303_v60 = vunpack.c.l.bf16 %v1302_v59 }
 0x346   : > { %v1066_v1 = vsub.f32 %v1058_v53, %v1065_v61 }
 0x347   : > { %931 = vadd.xlane.f32.xlu1 %v930_v63  ;;  %v1307_v28 = vrot.slane %v1303_v60, %v2618_v31 }
 0x348   : > { %v2636_v2 = vsel %vm700_vm1, %v1066_v1, 0.0 }
 0x349   : > { %v1068_v3 = vmul.f32 %v2636_v2, %v2636_v2 }
 0x34b   : > { %1069 = vadd.xlane.f32.xlu1 %v1068_v3 }
 0x3d4   : > { %v932_v19 = vpop.xlane.xlu1 %931 }
 0x3d5   : > { %v933_v20 = vmul.f32 0.03125, %v932_v19 }
 0x3d7   : > { %v934_v21 = vadd.f32 1e-05, %v933_v20 }
 0x3d8   : > { %v1070_v22 = vpop.xlane.xlu1 %1069 }
 0x3d9   : > { %1868 = vrsqrt.f32 %v934_v21  ;;  %v1071_v23 = vmul.f32 0.03125, %v1070_v22 }
 0x3db   : > { %v1072_v25 = vadd.f32 1e-05, %v1071_v23 }
 0x3dd   : > { %1870 = vrsqrt.f32 %v1072_v25 }
 0x3e3   : > { %v1869_v35 = vpop.eup %1868 }
 0x3e4   : > { %v936_v38 = vmul.f32 %v1869_v35, %v2632_v62 }
 0x3e6   : > { %v943_v41 = vmul.f32 %v942_v33, %v936_v38 }
 0x3e7   : > { %v1871_v44 = vpop.eup %1870 }
 0x3e8   : > { %v1074_v46 = vmul.f32 %v1871_v44, %v2636_v2  ;;  %v950_v47 = vadd.f32 %v949_v39, %v943_v41 }
 0x3ea   : > { %v1081_v50 = vmul.f32 %v1080_v42, %v1074_v46  ;;  %v951_v51 = vadd.f32 %v950_v47, %v702_v43 }
 0x3ec   : > { %v1090_v52 = vmul.f32 %v1517_v49, %v951_v51  ;;  %v1088_v53 = vadd.f32 %v1087_v48, %v1081_v50 }
 0x3ee   : > { %v1092_v55 = vpack.c.bf16 %v1090_v52, %v1090_v52  ;;  %v1089_v56 = vadd.f32 %v1088_v53, %v702_v43 }
 0x3f0   : > { %1706 = vmatmul.mubr.bf16.vlgmr.msra.gmra.mrb[8].mxu0 %v1092_v55  ;;  %v1091_v57 = vmul.f32 %v1518_v54, %v1089_v56 }
 0x3f2   : > { %v1109_v58 = vpack.c.bf16 %v1091_v57, %v1091_v57 }
 0x3f4   : > { %1686 = vmatmul.mubr.bf16.vlgmr.msra.gmra.mrb[4].mxu1 %v1109_v58 }
 0x4c3   : > { %v1296_v61 = vpop.f32.mrb[8].mxu0 }
 0x4c4   : > { %v1707_v62 = vpop.f32.mrb[9].mxu0 }
 0x4c5   : > { %v1299_v63 = vpop.f32.mrb[10].mxu0 }
 0x4c6   : > { %v1708_v1 = vpop.f32.mrb[11].mxu0 }
 0x4c7   : > { %v1208_v2 = vpop.f32.mrb[4].mxu1 }
 0x4c8   : > { %v1297_v3 = vadd.f32 %v1296_v61, %v1208_v2  ;;  %v1687_v0 = vpop.f32.mrb[5].mxu1 }
 0x4c9   : > { %v1211_v4 = vpop.f32.mrb[6].mxu1 }
 0x4ca   : > { %v1308_v5 = vadd.f32 %v1307_v28, %v1297_v3  ;;  %v1688_v6 = vpop.f32.mrb[7].mxu1 }
 0x4cc   : > { %v1559_v7 = vmul.f32 -1.442695, %v1308_v5 }
 0x4ce   : > { %1872 = vpow2.f32 %v1559_v7 }
 0x4d8   : > { %v1873_v8 = vpop.eup %1872 }
 0x4d9   : > { %v1312_v9 = vadd.f32 1.0, %v1873_v8 }
 0x4db   : > { %1874 = vrcp.f32 %v1312_v9 }
 0x4e5   : > { %v1875_v10 = vpop.eup %1874 }
 0x4e6   : > { %v1316_v11 = vsub.f32 1.0, %v1875_v10  ;;  %v1315_v12 = vmul.f32 %v1875_v10, %v1090_v52 }
 0x4e8   : > { %v1317_v13 = vmul.f32 %v1316_v11, %v1091_v57 }
 0x4ea   : > { %v1318_v31 = vadd.f32 %v1317_v13, %v1315_v12 }
 0x4ec   : > { %v1319_v14 = vadd.f32 %v1318_v31, %v951_v51 }
 0x4ee   : > { %v1320_v15 = vadd.f32 %v1319_v14, %v1089_v56 }
 0x4f0   : > { %v1321_v16 = vpack.c.bf16 %v1320_v15, %v1320_v15 }
 0x4f2   : > { %1322 = vst [vmem:[%s670_s3] sm:$0xf] %v1321_v16 }
 0x4f3   : > { %2081 = shalt.err (!%p2078_p11)
}
 0x4f4   : > { %s2082_s7 = scalar_lea.hbm %s2690_s23, 64  ;;  %s2086_s5 = scalar_lea.hbm %s2806_s9, 128 }
 0x4f5   : > { %p2083_p6 = scmp.ne.s32.totalorder %s2690_s23, %s2082_s7  ;;  %p2087_p5 = scmp.lt.u32.totalorder %s2690_s23, %s2806_s9 }
 0x4f6   : > { %p2088_p1 = scmp.lt.u32.totalorder %s2086_s5, %s2082_s7  ;;  %p2090_p13 = scmp.lt.u32.totalorder %s2082_s7, %s2690_s23 }
 0x4f7   : > { %p2084_p7 = pnand %p2083_p6, %p2807_p4 }
 0x4f8   : > { %p2089_p0 = por %p2088_p1, %p2087_p5 }
 0x4f9   : > { %p2085_p8 = pneg %p2084_p7 }
 0x4fa   : > { %p2091_p9 = por %p2090_p13, %p2089_p0 }
 0x4fc   : > { %p2092_p10 = pnand %p2091_p9, %p2085_p8 }
 0x4fe   : > { %2095 = shalt.err (!%p2092_p10)
}
 0x4ff   : > { %1731 = dma.vmem_to_hbm [thread:$0]  (%p2807_p4), %s2692_s14, 64, %s2690_s23, %s1324_s19  }
 0x500 PF: > { %s1350_s24 = sand.u32 1, %s2144_s1   ;;  %p2808_p12 = scmp.ne.s32.totalorder %s2792_s20, 0 }
 0x501   : > { %p2809_p3 = scmp.ge.s32.totalorder %s2164_s30, 2  ;;  %s1351_s17 = scalar_lea.sflag [#allocation7], %s1350_s24 }
 0x503   : > { %p1754_p2 = pnand %p2809_p3, %p2808_p12 }
 0x505   : > { %2139 = dma.done.wait (!%p1754_p2), %s1351_s17, 64  }
 0x506   : > { %2141 = vsyncadd (!%p1754_p2), %s1351_s17, 4294967232  ;;  %s45_s30 = sadd.s32 1, %s2164_s30   ;;  %s2810_s1 = smov %s2148_s26 }
 0x507   : > { %p42_p11 = scmp.ge.s32.totalorder %s45_s30, 4   ;;  %s2811_s26 = smov %s2152_s27 }
 0x508   : > { %s2812_s27 = smov %s2499_s13  ;;  %s2813_s28 = smov %s2160_s29 }
 0x509   : > { %s2814_s29 = smov %s2816_s22  ;;  %44 = sbr.rel (!%p42_p11) target bundleno = 39 (0x27), region = 155 }
 0x510   :  { %1356 = vsyncpa [#allocation6], 1 }
 0x511   :  { %1358 = vsyncpa [#allocation6 + $0x1], 1 }
 0x512   :  { %1359 = vsyncpa [#allocation9], 1 }
 0x513   :  { %1360 = vsyncpa [#allocation12], 1 }
 0x514   :  { %1361 = vsyncpa [#allocation15], 1 }
 0x515   :  { %1362 = vsyncpa [#allocation7], 1 }
 0x516   :  { %1364 = vsyncpa [#allocation7 + $0x1], 1 }

// kernel: tpu_custom_call.1
= control target key start
LH: loop header
LB: loop body
LE: loop exit
PB: predicated region body
PF: predicated region fallthrough
CT: control target
= control target key end

     0   :  { %s2739_s0 = inlined_call_operand.hbm [shape: s32[2], index: 0, kind: input, shape index: {}]   ;;  %s2740_s2 = inlined_call_operand.hbm [shape: bf16[2,8,128], index: 2, kind: input, shape index: {}]   ;;  %s2741_s3 = inlined_call_operand.vmem [shape: bf16[2,8,128], index: 3, kind: input, shape index: {}]   ;;  %s2742_s4 = inlined_call_operand.vmem [shape: bf16[8,128], index: 4, kind: input, shape index: {}]   ;;  %s2743_s5 = inlined_call_operand.hbm [shape: bf16[128,128], index: 5, kind: input, shape index: {}]   ;;  %s2744_s6 = inlined_call_operand.vmem [shape: bf16[1,128], index: 6, kind: input, shape index: {}]   ;;  %s2745_s7 = inlined_call_operand.hbm [shape: bf16[128,128], index: 7, kind: input, shape index: {}]   ;;  %s2746_s8 = inlined_call_operand.vmem [shape: bf16[1,128], index: 8, kind: input, shape index: {}]   ;;  %s2747_s9 = inlined_call_operand.vmem [shape: bf16[1,128], index: 9, kind: input, shape index: {}]   ;;  %s2748_s10 = inlined_call_operand.vmem [shape: bf16[1,128], index: 10, kind: input, shape index: {}]   ;;  %s2749_s11 = inlined_call_operand.hbm [shape: bf16[128,128], index: 11, kind: input, shape index: {}]   ;;  %s2750_s12 = inlined_call_operand.vmem [shape: bf16[1,128], index: 12, kind: input, shape index: {}]   ;;  %s2751_s13 = inlined_call_operand.vmem [shape: bf16[1,128], index: 13, kind: input, shape index: {}]   ;;  %s2752_s14 = inlined_call_operand.vmem [shape: bf16[1,128], index: 14, kind: input, shape index: {}]   ;;  %s2753_s15 = inlined_call_operand.hbm [shape: bf16[128,128], index: 15, kind: input, shape index: {}]   ;;  %s2754_s16 = inlined_call_operand.hbm [shape: bf16[128,128], index: 16, kind: input, shape index: {}]   ;;  %s2755_s17 = inlined_call_operand.vmem [shape: bf16[1,128], index: 17, kind: input, shape index: {}]   ;;  %s2756_s18 = inlined_call_operand.hbm [shape: bf16[2,8,128], index: 18, kind: output, shape index: {}]   ;;  %s2757_s1 = inlined_call_operand.vmem [shape: s32[2], index: 1, kind: input, shape index: {}]  }
   0x1   :  { %2767 = sst [smem:[#allocation23_spill]] %s2739_s0 }
   0x2   :  { %2768 = sst [smem:[#allocation24_spill]] %s2740_s2  ;;  %s2780_s29 = sld [smem:[#allocation23_spill]] }
   0x3   :  { %2769 = sst [smem:[#allocation25_spill]] %s2741_s3 }
   0x4   :  { %2770 = sst [smem:[#allocation26_spill]] %s2742_s4 }
   0x5   :  { %2771 = sst [smem:[#allocation27_spill]] %s2743_s5 }
   0x6   :  { %2772 = sst [smem:[#allocation28_spill]] %s2745_s7 }
   0x7   :  { %2773 = sst [smem:[#allocation29_spill]] %s2747_s9 }
   0x8   :  { %2774 = sst [smem:[#allocation30_spill]] %s2748_s10  ;;  %s1876_s4 = scalar_lea.hbm %s2780_s29, 16 }
   0x9   :  { %2775 = sst [smem:[#allocation31_spill]] %s2750_s12  ;;  %p1877_p0 = scmp.ne.s32.totalorder %s2780_s29, %s1876_s4 }
   0xa   :  { %2776 = sst [smem:[#allocation32_spill]] %s2751_s13  ;;  %p1880_p1 = scmp.lt.u32.totalorder %s1876_s4, %s2780_s29 }
   0xb   :  { %2777 = sst [smem:[#allocation33_spill]] %s2752_s14 }
   0xc   :  { %2778 = sst [smem:[#allocation34_spill]] %s2755_s17  ;;  %p1882_p2 = pnand %p1880_p1, %p1877_p0 }
   0xd   :  { %2779 = sst [smem:[#allocation35_spill]] %s2756_s18 }
   0xe   :  { %1885 = shalt.err (!%p1882_p2)  }
   0xf   :  { %s2166_s20 = smov [#allocation3]   ;;  %s25_s24 = sshll.u32 %s2757_s1, 4  ;;  %s26_s24 = int_to_ptr.vmem [resolvable:$true] %s25_s24 }
  0x10   :  { %24 = dma.hbm_to_smem %s2780_s29, 16, %s2166_s20, [#allocation2] }
  0x11   :  { %s1886_s25 = scalar_lea.vmem %s26_s24, 16  ;;  %p1891_p4 = scmp.lt.s32.totalorder %s26_s24, %s26_s24 }
  0x12   :  { %p1887_p3 = scmp.ne.s32.totalorder %s26_s24, %s1886_s25  ;;  %p1892_p5 = scmp.lt.s32.totalorder %s1886_s25, %s1886_s25 }
  0x14   :  { %p1893_p6 = por %p1892_p5, %p1891_p4 }
  0x16   :  { %p1894_p7 = pnand %p1893_p6, %p1887_p3 }
  0x18   :  { %1897 = shalt.err (!%p1894_p7)  }
  0x19   :  { %s2167_s4 = smov [#allocation4]  }
  0x1a   :  { %28 = dma.vmem_to_smem %s26_s24, 16, %s2167_s4, [#allocation2] }
  0x1b   :  { %2120 = dma.done.wait [#allocation2], 32 }
  0x1c   :  { %2121 = vsyncadd [#allocation2], 4294967264 }
  0x1d   :  { %30 = sfence }
  0x1e   :  { %31 = vsyncpa [#allocation6], 0 }
  0x1f   :  { %33 = vsyncpa [#allocation6 + $0x1], 0 }
  0x20   :  { %34 = vsyncpa [#allocation9], 0 }
  0x21   :  { %35 = vsyncpa [#allocation12], 0 }
  0x22   :  { %36 = vsyncpa [#allocation15], 0 }
  0x23   :  { %37 = vsyncpa [#allocation7], 0 }
  0x24   :  { %39 = vsyncpa [#allocation7 + $0x1], 0  ;;  %s2289_s1 = smov 0   ;;  %s2291_s26 = smov 0  }
  0x25   :  { %s2293_s27 = smov 0   ;;  %s2295_s28 = smov 0  }
  0x26   :  { %s2297_s29 = smov 0   ;;  %s2299_s30 = smov 0  }
  0x27 LB: > { %s2760_s0 = sadd.s32 4294967295, %s2164_s30   ;;  %p1498_p8 = scmp.ge.s32.totalorder %s2164_s30, 1  ;;  %s2164_s30 = sphi %s2299_s30, %s45_s30   ;;  %s2160_s29 = sphi %s2297_s29, %s2814_s29   ;;  %s2156_s28 = sphi %s2295_s28, %s2813_s28   ;;  %s2152_s27 = sphi %s2293_s27, %s2812_s27   ;;  %s2148_s26 = sphi %s2291_s26, %s2811_s26   ;;  %s2144_s1 = sphi %s2289_s1, %s2810_s1  }
  0x28   : > { %p2323_p9 = scmp.eq.s32.totalorder %s2760_s0, 0  ;;  %p445_p10 = scmp.lt.s32.totalorder %s2164_s30, 3 }
  0x29   : > { %s2168_s20 = smov [#allocation8]   ;;  %s2169_s3 = smov [#allocation11]  }
  0x2a   : > { %s2781_s19 = scalar_select %p2323_p9, 1, 0 }
  0x2b   : > { %p2328_p11 = pnand %p1498_p8, %p445_p10  ;;  %s464_s21 = sshll.u32 %s2168_s20, 4  ;;  %s2332_s21 = int_to_ptr.vmem [resolvable:$true] %s464_s21 }
  0x2c   : > { %s502_s23 = sshll.u32 %s2169_s3, 4  ;;  %s2170_s24 = smov [#allocation10]   ;;  %s2343_s23 = int_to_ptr.vmem [resolvable:$true] %s502_s23 }
  0x2d   : > { %s2782_s2 = scalar_select %p2328_p11, 1, 0 }
  0x2e   : > { %p1733_p12 = pneg %p2328_p11  ;;  %s2345_s25 = sshll.u32 %s2170_s24, 4  ;;  %s481_s25 = int_to_ptr.vmem [resolvable:$true] %s2345_s25 }
  0x2f   : > { %s2784_s5 = sld [smem:[#allocation27_spill]] }
  0x30   : > { %p2339_p0 = pnand %p1733_p12, %p2323_p9 }
  0x32   : > { %p2355_p2 = pneg %p2339_p0 }
  0x35   : > { %s1898_s0 = scalar_lea.hbm %s2784_s5, 1024 }
  0x36   : > { %p1899_p1 = scmp.ne.s32.totalorder %s2784_s5, %s1898_s0  ;;  %p1905_p5 = scmp.lt.u32.totalorder %s1898_s0, %s2784_s5 }
  0x38   : > { %p1901_p3 = pnand %p2355_p2, %p1899_p1 }
  0x3a   : > { %p1902_p4 = pneg %p1901_p3 }
  0x3c   : > { %p1907_p6 = pnand %p1905_p5, %p1902_p4 }
  0x3e   : > { %1910 = shalt.err (!%p1907_p6)
}
  0x3f   : > { %s1911_s17 = scalar_lea.vmem %s2332_s21, 1024  ;;  %p1919_p12 = scmp.lt.s32.totalorder %s2332_s21, %s2332_s21 }
  0x40   : > { %p1912_p7 = scmp.ne.s32.totalorder %s2332_s21, %s1911_s17  ;;  %p1920_p13 = scmp.lt.s32.totalorder %s1911_s17, %s1911_s17 }
  0x42   : > { %p1914_p8 = pnand %p1912_p7, %p2355_p2  ;;  %p1921_p1 = por %p1920_p13, %p1919_p12 }
  0x44   : > { %p1915_p10 = pneg %p1914_p8 }
  0x46   : > { %p1922_p3 = pnand %p1921_p1, %p1915_p10 }
  0x48   : > { %1925 = shalt.err (!%p1922_p3)
}
  0x49   : > { %s2171_s18 = smov 64   ;;  %s2172_s0 = smov 4  }
  0x4a   : > { %1736 = dma.hbm_to_vmem [thread:$0]  (!%p2339_p0), %s2784_s5, 1024, %s2332_s21, [#allocation9], %s2171_s18, %s2171_s18, %s2172_s0  }
  0x4b   : > { %s1926_s17 = scalar_lea.hbm %s2749_s11, 1024 }
  0x4c   : > { %p1927_p13 = scmp.ne.s32.totalorder %s2749_s11, %s1926_s17  ;;  %p1933_p6 = scmp.lt.u32.totalorder %s1926_s17, %s2749_s11 }
  0x4e   : > { %p1929_p4 = pnand %p1927_p13, %p2355_p2 }
  0x50   : > { %p1930_p5 = pneg %p1929_p4 }
  0x52   : > { %p1935_p7 = pnand %p1933_p6, %p1930_p5 }
  0x54   : > { %1938 = shalt.err (!%p1935_p7)
}
  0x55   : > { %s1939_s21 = scalar_lea.vmem %s2343_s23, 1024  ;;  %p1947_p1 = scmp.lt.s32.totalorder %s2343_s23, %s2343_s23 }
  0x56   : > { %p1940_p8 = scmp.ne.s32.totalorder %s2343_s23, %s1939_s21  ;;  %p1948_p3 = scmp.lt.s32.totalorder %s1939_s21, %s1939_s21 }
  0x58   : > { %p1942_p10 = pnand %p1940_p8, %p2355_p2  ;;  %p1949_p13 = por %p1948_p3, %p1947_p1 }
  0x5a   : > { %p1943_p12 = pneg %p1942_p10 }
  0x5c   : > { %p1950_p4 = pnand %p1949_p13, %p1943_p12 }
  0x5e   : > { %1953 = shalt.err (!%p1950_p4)
}
  0x5f   : > { %1742 = dma.hbm_to_vmem [thread:$0]  (!%p2339_p0), %s2749_s11, 1024, %s2343_s23, [#allocation12], %s2171_s18, %s2171_s18, %s2172_s0  }
  0x60   : > { %s2786_s7 = sld [smem:[#allocation28_spill]] }
  0x66   : > { %s1954_s4 = scalar_lea.hbm %s2786_s7, 1024 }
  0x67   : > { %p1955_p5 = scmp.ne.s32.totalorder %s2786_s7, %s1954_s4  ;;  %p1961_p8 = scmp.lt.u32.totalorder %s1954_s4, %s2786_s7 }
  0x69   : > { %p1957_p6 = pnand %p1955_p5, %p2355_p2 }
  0x6b   : > { %p1958_p7 = pneg %p1957_p6 }
  0x6d   : > { %p1963_p10 = pnand %p1961_p8, %p1958_p7 }
  0x6f   : > { %1966 = shalt.err (!%p1963_p10)
}
  0x70   : > { %s1967_s21 = scalar_lea.vmem %s481_s25, 1024  ;;  %p1975_p13 = scmp.lt.s32.totalorder %s481_s25, %s481_s25 }
  0x71   : > { %p1968_p12 = scmp.ne.s32.totalorder %s481_s25, %s1967_s21  ;;  %p1976_p4 = scmp.lt.s32.totalorder %s1967_s21, %s1967_s21 }
  0x73   : > { %p1970_p1 = pnand %p1968_p12, %p2355_p2  ;;  %p1977_p11 = por %p1976_p4, %p1975_p13 }
  0x75   : > { %p1971_p3 = pneg %p1970_p1 }
  0x77   : > { %p1978_p9 = pnand %p1977_p11, %p1971_p3 }
  0x79   : > { %1981 = shalt.err (!%p1978_p9)
}
  0x7a   : > { %1739 = dma.hbm_to_vmem [thread:$0]  (!%p2339_p0), %s2786_s7, 1024, %s481_s25, [#allocation9], %s2171_s18, %s2171_s18, %s2172_s0  }
  0x7b   : > { %s2173_s10 = smov [#allocation13]   ;;  %s2174_s13 = smov [#allocation14]  }
  0x7c   : > { %s524_s12 = sshll.u32 %s2173_s10, 4  ;;  %s537_s4 = sshll.u32 %s2174_s13, 4  ;;  %s525_s12 = int_to_ptr.vmem [resolvable:$true] %s524_s12  ;;  %s538_s4 = int_to_ptr.vmem [resolvable:$true] %s537_s4 }
  0x7d   : > { %s1982_s24 = scalar_lea.hbm %s2753_s15, 1024 }
  0x7e   : > { %p1983_p9 = scmp.ne.s32.totalorder %s2753_s15, %s1982_s24  ;;  %p1989_p6 = scmp.lt.u32.totalorder %s1982_s24, %s2753_s15 }
  0x80   : > { %p1985_p11 = pnand %p1983_p9, %p2355_p2 }
  0x82   : > { %p1986_p5 = pneg %p1985_p11 }
  0x84   : > { %p1991_p7 = pnand %p1989_p6, %p1986_p5 }
  0x86   : > { %1994 = shalt.err (!%p1991_p7)
}
  0x87   : > { %s1995_s25 = scalar_lea.vmem %s525_s12, 1024  ;;  %p2003_p1 = scmp.lt.s32.totalorder %s525_s12, %s525_s12 }
  0x88   : > { %p1996_p8 = scmp.ne.s32.totalorder %s525_s12, %s1995_s25  ;;  %p2004_p3 = scmp.lt.s32.totalorder %s1995_s25, %s1995_s25 }
  0x8a   : > { %p1998_p10 = pnand %p1996_p8, %p2355_p2  ;;  %p2005_p13 = por %p2004_p3, %p2003_p1 }
  0x8c   : > { %p1999_p12 = pneg %p1998_p10 }
  0x8e   : > { %p2006_p4 = pnand %p2005_p13, %p1999_p12 }
  0x90   : > { %2009 = shalt.err (!%p2006_p4)
}
  0x91   : > { %1745 = dma.hbm_to_vmem [thread:$0]  (!%p2339_p0), %s2753_s15, 1024, %s525_s12, [#allocation12], %s2171_s18, %s2171_s18, %s2172_s0  }
  0x92   : > { %s2010_s20 = scalar_lea.hbm %s2754_s16, 1024 }
  0x93   : > { %p2011_p9 = scmp.ne.s32.totalorder %s2754_s16, %s2010_s20  ;;  %p2017_p6 = scmp.lt.u32.totalorder %s2010_s20, %s2754_s16 }
  0x95   : > { %p2013_p11 = pnand %p2011_p9, %p2355_p2 }
  0x97   : > { %p2014_p5 = pneg %p2013_p11 }
  0x99   : > { %p2019_p7 = pnand %p2017_p6, %p2014_p5 }
  0x9b   : > { %2022 = shalt.err (!%p2019_p7)
}
  0x9c   : > { %s2023_s23 = scalar_lea.vmem %s538_s4, 1024  ;;  %p2031_p1 = scmp.lt.s32.totalorder %s538_s4, %s538_s4 }
  0x9d   : > { %p2024_p8 = scmp.ne.s32.totalorder %s538_s4, %s2023_s23  ;;  %p2032_p3 = scmp.lt.s32.totalorder %s2023_s23, %s2023_s23 }
  0x9f   : > { %p2026_p10 = pnand %p2024_p8, %p2355_p2  ;;  %p2033_p13 = por %p2032_p3, %p2031_p1 }
  0xa1   : > { %p2027_p12 = pneg %p2026_p10 }
  0xa3   : > { %p2034_p4 = pnand %p2033_p13, %p2027_p12 }
  0xa5   : > { %2037 = shalt.err (!%p2034_p4)
}
  0xa6   : > { %1748 = dma.hbm_to_vmem [thread:$0]  (!%p2339_p0), %s2754_s16, 1024, %s538_s4, [#allocation15], %s2171_s18, %s2171_s18, %s2172_s0  }
  0xa7   : > { %s1497_s14 = sadd.s32 4294967294, %s2164_s30   ;;  %s57_s22 = sadd.s32 1, %s2160_s29 }
  0xa8   : > { %s66_s5 = sadd.s32 1, %s2152_s27  ;;  %p59_p2 = scmp.ge.s32.totalorder %s57_s22, 2 }
  0xa9   : > { %p73_p9 = scmp.ne.s32.totalorder %s2152_s27, %s2148_s26  ;;  %p74_p11 = scmp.eq.s32.totalorder %s2164_s30, 0 }
  0xaa   : > { %p79_p5 = scmp.ne.s32.totalorder %s2148_s26, %s2144_s1  ;;  %s2816_s22 = smov (%p59_p2, %s57_s22), 0 }
  0xab   : > { %p2479_p6 = por %p74_p11, %p73_p9  ;;  %p2788_p7 = scmp.ne.s32.totalorder %s2781_s19, 0 }
  0xac   : > { %s61_s0 = ssub.s32 %s2160_s29, %s2816_s22  ;;  %s2790_s4 = sadd.s32 4294967295, %s2164_s30  }
  0xad   : > { %p2485_p0 = por %p2788_p7, %p79_p5  ;;  %p432_p8 = scmp.eq.s32.totalorder %s2790_s4, 1 }
  0xae   : > { %p64_p10 = scmp.eq.s32.totalorder %s61_s0, 0  ;;  %p438_p12 = scmp.eq.s32.totalorder %s1497_s14, 1 }
  0xaf   : > { %p2493_p1 = por %p432_p8, %p73_p9  ;;  %p1762_p3 = scmp.lt.s32.totalorder %s2164_s30, 2 }
  0xb0   : > { %s2499_s13 = scalar_select %p64_p10, %s2152_s27, %s66_s5  }
  0xb1   : > { %s2791_s10 = scalar_select %p2493_p1, 1, 0 }
  0xb2   : > { %p2501_p13 = por %p438_p12, %p79_p5  ;;  %s554_s3 = sand.u32 1, %s2152_s27  }
  0xb3   : > { %s1506_s24 = sshll.u32 %s554_s3, 2  ;;  %s1507_s17 = sshll.u32 %s2160_s29, 6 }
  0xb4   : > { %s2792_s20 = scalar_select %p2501_p13, 1, 0 }
  0xb5   : > { %s2793_s12 = sld [smem:[#allocation24_spill]]  ;;  %s558_s14 = scalar_lea.vmem [#allocation5], %s1506_s24 }
  0xb6   : > { %s566_s0 = sshll.u32 %s558_s14, 4  ;;  %p2516_p4 = pnand %p1762_p3, %p2479_p6  ;;  %s2512_s0 = int_to_ptr.vmem [resolvable:$true] %s566_s0 }
  0xb7   : > { %s555_s4 = scalar_lea.sflag [#allocation6], %s554_s3 }
  0xb8   : > { %p2040_p9 = pneg %p2516_p4 }
  0xbb   : > { %s2510_s25 = scalar_lea.hbm %s2793_s12, %s1507_s17  ;;  %s2043_s21 = scalar_lea.hbm %s2793_s12, 128 }
  0xbc   : > { %s2038_s7 = scalar_lea.hbm %s2510_s25, 64  ;;  %p2044_p6 = scmp.lt.u32.totalorder %s2510_s25, %s2793_s12 }
  0xbd   : > { %p2039_p2 = scmp.ne.s32.totalorder %s2510_s25, %s2038_s7  ;;  %p2045_p7 = scmp.lt.u32.totalorder %s2043_s21, %s2038_s7 }
  0xbe   : > { %p2047_p10 = scmp.lt.u32.totalorder %s2038_s7, %s2510_s25 }
  0xbf   : > { %p2041_p11 = pnand %p2040_p9, %p2039_p2  ;;  %p2046_p8 = por %p2045_p7, %p2044_p6 }
  0xc1   : > { %p2042_p5 = pneg %p2041_p11  ;;  %p2048_p12 = por %p2047_p10, %p2046_p8 }
  0xc3   : > { %p2049_p3 = pnand %p2048_p12, %p2042_p5 }
  0xc5   : > { %2052 = shalt.err (!%p2049_p3)
}
  0xc6   : > { %s2053_s3 = scalar_lea.vmem %s2512_s0, 64  ;;  %s2175_s14 = smov [#allocation5]  }
  0xc7   : > { %p2054_p2 = scmp.ne.s32.totalorder %s2512_s0, %s2053_s3  ;;  %s2058_s24 = sshll.u32 %s2175_s14, 4  ;;  %s2059_s24 = int_to_ptr.vmem [resolvable:$false] %s2058_s24 }
  0xc8   : > { %s2060_s17 = scalar_lea.vmem %s2059_s24, 128  ;;  %p2061_p1 = scmp.lt.s32.totalorder %s2512_s0, %s2059_s24 }
  0xc9   : > { %p2056_p11 = pnand %p2054_p2, %p2040_p9  ;;  %p2062_p6 = scmp.lt.s32.totalorder %s2060_s17, %s2053_s3 }
  0xcb   : > { %p2057_p13 = pneg %p2056_p11  ;;  %p2063_p7 = por %p2062_p6, %p2061_p1 }
  0xcd   : > { %p2064_p8 = pnand %p2063_p7, %p2057_p13 }
  0xcf   : > { %2067 = shalt.err (!%p2064_p8)
}
  0xd0   : > { %1752 = dma.hbm_to_vmem [thread:$0]  (!%p2516_p4), %s2510_s25, 64, %s2512_s0, %s555_s4  }
  0xd1   : > { %p2795_p5 = scmp.ne.s32.totalorder %s2782_s2, 0 }
  0xd2   : > { %s2548_s7 = sand.u32 (!%p2795_p5), 1, %s2148_s26  }
  0xd3   : > { %585 = sbr.rel (%p2795_p5) target bundleno = 1280 (0x500), region = 84  ;;  %s2766_s21 = sshll.u32 (!%p2795_p5), %s2548_s7, 2 }
  0xd4   : > { %s588_s9 = scalar_lea.sflag (!%p2795_p5), [#allocation6], %s2548_s7  ;;  %s2554_s23 = scalar_lea.vmem (!%p2795_p5), [#allocation5], %s2766_s21 }
  0xda   : > { %2123 = dma.done.wait (%p2485_p0), %s588_s9, 64  }
  0xdb   : > { %2125 = vsyncadd (%p2485_p0), %s588_s9, 4294967232  ;;  %p2796_p1 = scmp.ne.s32.totalorder %s2781_s19, 0 }
  0xdd   : > { %2127 = dma.done.wait (%p2796_p1), [#allocation9], 2048  }
  0xde   : > { %2129 = vsyncadd (%p2796_p1), [#allocation9], 4294965248 }
  0xdf   : > { %2131 = dma.done.wait (%p2796_p1), [#allocation12], 2048  }
  0xe0   : > { %2133 = vsyncadd (%p2796_p1), [#allocation12], 4294965248 }
  0xe1   : > { %2135 = dma.done.wait (%p2796_p1), [#allocation15], 1024  }
  0xe2   : > { %2137 = vsyncadd (%p2796_p1), [#allocation15], 4294966272  ;;  %v2176_v0 = vmov 0.0   ;;  %vm2177_vm0 = vmmov 0   ;;  %v1828_v1 = vld [vmem:[#allocation8] sm:$0xff]   ;;  %v1829_v2 = vld [vmem:[#allocation8 + $0x8] sm:$0xff]   ;;  %v684_v27 = vlaneseq }
  0xe3   : > { %1609 = vmatprep.subr.bf16.mxu0 %v2176_v0  ;;  %1625 = vmatprep.mubr.msk.bf16.mxu0 %vm2177_vm0, %v2176_v0  ;;  %v1830_v3 = vld [vmem:[#allocation8 + $0x10] sm:$0xff]   ;;  %v1836_v4 = vld [vmem:[#allocation10] sm:$0xff]   ;;  %v1831_v5 = vld [vmem:[#allocation8 + $0x18] sm:$0xff]   ;;  %p671_p0 = scmp.lt.s32.totalorder %s2156_s28, 1  ;;  %s2797_s0 = sld [smem:[#allocation25_spill]] }
  0xe4   : > { %1629 = vmatprep.subr.bf16.mxu1 %v2176_v0  ;;  %1645 = vmatprep.mubr.msk.bf16.mxu1 %vm2177_vm0, %v2176_v0  ;;  %v1838_v6 = vld [vmem:[#allocation10 + $0x8] sm:$0xff]   ;;  %v1832_v7 = vld [vmem:[#allocation8 + $0x20] sm:$0xff]   ;;  %v1840_v8 = vld [vmem:[#allocation10 + $0x10] sm:$0xff]   ;;  %v2612_v28 = vshrl.u32 %v684_v27, 7  ;;  %v699_v56 = vand.u32 127, %v684_v27  ;;  %s2799_s18 = sld [smem:[#allocation29_spill]] }
  0xe5   : > { %1610 = vmatpush3.bf16.msra.mxu0 %v1828_v1  ;;  %1630 = vmatpush3.bf16.msra.mxu1 %v1836_v4  ;;  %v1833_v9 = vld [vmem:[#allocation8 + $0x28] sm:$0xff]   ;;  %v1842_v10 = vld [vmem:[#allocation10 + $0x18] sm:$0xff]   ;;  %v1834_v11 = vld [vmem:[#allocation8 + $0x30] sm:$0xff]   ;;  %s672_s19 = scalar_select %p671_p0, %s2156_s28, 1 }
  0xe6   : > { %1611 = vmatprep.subr.bf16.mxu0 %v2176_v0  ;;  %1631 = vmatprep.subr.bf16.mxu1 %v2176_v0  ;;  %v1844_v12 = vld [vmem:[#allocation10 + $0x20] sm:$0xff]   ;;  %v1835_v13 = vld [vmem:[#allocation8 + $0x38] sm:$0xff]   ;;  %v1846_v14 = vld [vmem:[#allocation10 + $0x28] sm:$0xff]   ;;  %v2618_v31 = vsub.s32 0, %v2612_v28  ;;  %vm700_vm1 = vcmp.lt.s32.totalorder %v699_v56, 32  ;;  %s688_s25 = sld [smem:[#allocation3 + %s2156_s28]] }
  0xe7   : > { %v703_v15 = vld [vmem:[%s2554_s23] sm:$0xf]  ;;  %v1837_v16 = vld [vmem:[#allocation11] sm:$0xff]   ;;  %v1848_v17 = vld [vmem:[#allocation10 + $0x30] sm:$0xff]   ;;  %s1516_s2 = sshll.u32 %s672_s19, 2  ;;  %s2798_s23 = sld [smem:[#allocation31_spill]] }
  0xe8   : > { %v1839_v18 = vld [vmem:[#allocation11 + $0x8] sm:$0xff]   ;;  %v1841_v19 = vld [vmem:[#allocation11 + $0x10] sm:$0xff]   ;;  %v1843_v20 = vld [vmem:[#allocation11 + $0x18] sm:$0xff]   ;;  %s2800_s4 = sld [smem:[#allocation30_spill]]  ;;  %s2801_s24 = sld [smem:[#allocation32_spill]] }
  0xe9   : > { %1612 = vmatpush3.bf16.msra.mxu0 %v1829_v2  ;;  %1632 = vmatpush3.bf16.msra.mxu1 %v1838_v6  ;;  %v1845_v21 = vld [vmem:[#allocation11 + $0x20] sm:$0xff]   ;;  %v1847_v22 = vld [vmem:[#allocation11 + $0x28] sm:$0xff]   ;;  %v1849_v23 = vld [vmem:[#allocation11 + $0x30] sm:$0xff]   ;;  %s677_s5 = scalar_lea.vmem %s2797_s0, %s1516_s2  ;;  %s693_s17 = sld [smem:[#allocation4 + %s2156_s28]] }
  0xea   : > { %1613 = vmatprep.subr.bf16.mxu0 %v2176_v0  ;;  %1633 = vmatprep.subr.bf16.mxu1 %v2176_v0  ;;  %v1850_v24 = vld [vmem:[#allocation10 + $0x38] sm:$0xff]   ;;  %v952_v26 = vld [vmem:[%s677_s5] sm:$0xf]  ;;  %v1852_v55 = vld [vmem:[#allocation13] sm:$0xff]   ;;  %s2802_s21 = sld [smem:[#allocation33_spill]]  ;;  %s2804_s0 = sld [smem:[#allocation34_spill]] }
  0xeb   : > { %v1851_v25 = vld [vmem:[#allocation11 + $0x38] sm:$0xff]   ;;  %v720_v29 = vld [vmem:[%s2744_s6] sm:$0x1]  ;;  %v1853_v4 = vld [vmem:[#allocation14] sm:$0xff]   ;;  %s1561_s5 = sshll.u32 %s2156_s28, 6  ;;  %s2806_s9 = sld [smem:[#allocation35_spill]] }
  0xec   : > { %v721_v30 = vunpack.c.l.bf16 %v720_v29  ;;  %v831_v43 = vld [vmem:[%s2746_s8] sm:$0x1]  ;;  %s1324_s19 = scalar_lea.sflag [#allocation7], %s2548_s7  ;;  %p2807_p4 = scmp.ne.s32.totalorder %s2791_s10, 0 }
  0xed   : > { %1614 = vmatpush3.bf16.msra.mxu0 %v1830_v3  ;;  %1634 = vmatpush3.bf16.msra.mxu1 %v1840_v8  ;;  %v969_v44 = vld [vmem:[%s2798_s23] sm:$0x1]  ;;  %v832_v45 = vunpack.c.l.bf16 %v831_v43  ;;  %v1857_v8 = vld [vmem:[#allocation14 + $0x10] sm:$0xff]   ;;  %s2178_s28 = smov [#allocation16]  }
  0xee   : > { %1615 = vmatprep.subr.bf16.mxu0 %v2176_v0  ;;  %1635 = vmatprep.subr.bf16.mxu1 %v2176_v0  ;;  %v725_v32 = vrot.slane %v721_v30, %v2618_v31  ;;  %v970_v46 = vunpack.c.l.bf16 %v969_v44  ;;  %v1855_v6 = vld [vmem:[#allocation14 + $0x8] sm:$0xff]  }
  0xef   : > { %v836_v47 = vrot.slane %v832_v45, %v2618_v31  ;;  %v1075_v29 = vld [vmem:[%s2801_s24] sm:$0x1]  ;;  %v694_v45 = vstv %s693_s17 }
  0xf0   : > { %v974_v48 = vrot.slane %v970_v46, %v2618_v31  ;;  %vm695_vm3 = vcmp.lt.s32.totalorder %v2612_v28, %v694_v45 }
  0xf1   : > { %1616 = vmatpush3.bf16.msra.mxu0 %v1831_v5  ;;  %1636 = vmatpush3.bf16.msra.mxu1 %v1842_v10  ;;  %v1854_v5 = vld [vmem:[#allocation13 + $0x8] sm:$0xff]   ;;  %v1859_v10 = vld [vmem:[#allocation14 + $0x18] sm:$0xff]   ;;  %s2690_s23 = scalar_lea.hbm %s2806_s9, %s1561_s5 }
  0xf2   : > { %1617 = vmatprep.subr.bf16.mxu0 %v2176_v0  ;;  %1637 = vmatprep.subr.bf16.mxu1 %v2176_v0 }
  0xf5   : > { %1618 = vmatpush3.bf16.msra.mxu0 %v1832_v7  ;;  %1638 = vmatpush3.bf16.msra.mxu1 %v1844_v12  ;;  %v1856_v7 = vld [vmem:[#allocation13 + $0x10] sm:$0xff]   ;;  %v1861_v12 = vld [vmem:[#allocation14 + $0x20] sm:$0xff]  }
  0xf6   : > { %1619 = vmatprep.subr.bf16.mxu0 %v2176_v0  ;;  %1639 = vmatprep.subr.bf16.mxu1 %v2176_v0 }
  0xf9   : > { %1620 = vmatpush3.bf16.msra.mxu0 %v1833_v9  ;;  %1640 = vmatpush3.bf16.msra.mxu1 %v1846_v14  ;;  %v1858_v9 = vld [vmem:[#allocation13 + $0x18] sm:$0xff]   ;;  %v1863_v14 = vld [vmem:[#allocation14 + $0x28] sm:$0xff]  }
  0xfa   : > { %1621 = vmatprep.subr.bf16.mxu0 %v2176_v0  ;;  %1641 = vmatprep.subr.bf16.mxu1 %v2176_v0 }
  0xfd   : > { %1622 = vmatpush3.bf16.msra.mxu0 %v1834_v11  ;;  %1642 = vmatpush3.bf16.msra.mxu1 %v1848_v17  ;;  %v1860_v11 = vld [vmem:[#allocation13 + $0x20] sm:$0xff]   ;;  %v1866_v17 = vld [vmem:[#allocation13 + $0x38] sm:$0xff]  }
  0xfe   : > { %1623 = vmatprep.subr.bf16.mxu0 %v2176_v0  ;;  %1643 = vmatprep.subr.bf16.mxu1 %v2176_v0 }
 0x101   : > { %1624 = vmatpush3.bf16.msra.mxu0 %v1835_v13  ;;  %1644 = vmatpush3.bf16.msra.mxu1 %v1850_v24  ;;  %v1862_v13 = vld [vmem:[#allocation13 + $0x28] sm:$0xff]  }
 0x102   : > { %1649 = vmatprep.subr.bf16.mxu0 %v2176_v0  ;;  %1669 = vmatprep.subr.bf16.mxu1 %v2176_v0  ;;  %v937_v24 = vld [vmem:[%s2799_s18] sm:$0x1]  ;;  %s2803_s18 = sld [smem:[#allocation26_spill]] }
 0x103   : > { %v938_v27 = vunpack.c.l.bf16 %v937_v24 }
 0x104   : > { %1626 = vmatmul.mubr.bf16.vlgmr.msra.gmra.mrb[0].mxu0 %v703_v15  ;;  %v1864_v15 = vld [vmem:[#allocation13 + $0x30] sm:$0xff]  }
 0x105   : > { %1650 = vmatpush3.bf16.msra.mxu0 %v1837_v16  ;;  %1665 = vmatprep.mubr.msk.bf16.mxu0 %vm2177_vm0, %v2176_v0  ;;  %v1865_v16 = vld [vmem:[#allocation14 + $0x30] sm:$0xff]  }
 0x106   : > { %1651 = vmatprep.subr.bf16.mxu0 %v2176_v0 }
 0x109   : > { %1652 = vmatpush3.bf16.msra.mxu0 %v1839_v18  ;;  %v1867_v18 = vld [vmem:[#allocation14 + $0x38] sm:$0xff]  }
 0x10a   : > { %1653 = vmatprep.subr.bf16.mxu0 %v2176_v0 }
 0x10d   : > { %1654 = vmatpush3.bf16.msra.mxu0 %v1841_v19 }
 0x10e   : > { %1655 = vmatprep.subr.bf16.mxu0 %v2176_v0 }
 0x111   : > { %1656 = vmatpush3.bf16.msra.mxu0 %v1843_v20 }
 0x112   : > { %1657 = vmatprep.subr.bf16.mxu0 %v2176_v0 }
 0x115   : > { %1658 = vmatpush3.bf16.msra.mxu0 %v1845_v21 }
 0x116   : > { %1659 = vmatprep.subr.bf16.mxu0 %v2176_v0 }
 0x119   : > { %1660 = vmatpush3.bf16.msra.mxu0 %v1847_v22 }
 0x11a   : > { %1661 = vmatprep.subr.bf16.mxu0 %v2176_v0 }
 0x11d   : > { %1662 = vmatpush3.bf16.msra.mxu0 %v1849_v23 }
 0x11e   : > { %1663 = vmatprep.subr.bf16.mxu0 %v2176_v0 }
 0x121   : > { %1664 = vmatpush3.bf16.msra.mxu0 %v1851_v25 }
 0x122   : > { %1689 = vmatprep.subr.bf16.mxu0 %v2176_v0 }
 0x124   : > { %1666 = vmatmul.mubr.bf16.vlgmr.msra.gmra.mrb[4].mxu0 %v952_v26  ;;  %v944_v26 = vld [vmem:[%s2800_s4] sm:$0x1]  ;;  %s2805_s4 = sshll.u32 %s2548_s7, 2 }
 0x125   : > { %1705 = vmatprep.mubr.msk.bf16.mxu0 %vm2177_vm0, %v2176_v0  ;;  %1690 = vmatpush3.bf16.msra.mxu0 %v1852_v55  ;;  %v945_v30 = vunpack.c.l.bf16 %v944_v26  ;;  %s670_s3 = scalar_lea.vmem [#allocation16], %s2805_s4 }
 0x126   : > { %1691 = vmatprep.subr.bf16.mxu0 %v2176_v0  ;;  %s1338_s14 = sshll.u32 %s670_s3, 4  ;;  %s2692_s14 = int_to_ptr.vmem [resolvable:$true] %s1338_s14 }
 0x127   : > { %s2068_s2 = scalar_lea.vmem %s2692_s14, 64 }
 0x128   : > { %p2069_p13 = scmp.ne.s32.totalorder %s2692_s14, %s2068_s2 }
 0x129   : > { %1692 = vmatpush3.bf16.msra.mxu0 %v1854_v5 }
 0x12a   : > { %1693 = vmatprep.subr.bf16.mxu0 %v2176_v0  ;;  %p2070_p9 = pnand %p2069_p13, %p2807_p4 }
 0x12c   : > { %p2071_p10 = pneg %p2070_p9 }
 0x12d   : > { %1694 = vmatpush3.bf16.msra.mxu0 %v1856_v7 }
 0x12e   : > { %1695 = vmatprep.subr.bf16.mxu0 %v2176_v0 }
 0x131   : > { %1696 = vmatpush3.bf16.msra.mxu0 %v1858_v9 }
 0x132   : > { %1697 = vmatprep.subr.bf16.mxu0 %v2176_v0 }
 0x135   : > { %1698 = vmatpush3.bf16.msra.mxu0 %v1860_v11 }
 0x136   : > { %1699 = vmatprep.subr.bf16.mxu0 %v2176_v0 }
 0x139   : > { %1700 = vmatpush3.bf16.msra.mxu0 %v1862_v13 }
 0x13a   : > { %1701 = vmatprep.subr.bf16.mxu0 %v2176_v0 }
 0x13d   : > { %1702 = vmatpush3.bf16.msra.mxu0 %v1864_v15 }
 0x13e   : > { %1703 = vmatprep.subr.bf16.mxu0 %v2176_v0 }
 0x141   : > { %1704 = vmatpush3.bf16.msra.mxu0 %v1866_v17 }
 0x1d7   : > { %v808_v33 = vpop.f32.mrb[0].mxu0 }
 0x1d8   : > { %v809_v34 = vadd.f32 %v808_v33, %v725_v32  ;;  %v1627_v35 = vpop.f32.mrb[1].mxu0  ;;  %v1082_v32 = vld [vmem:[%s2802_s21] sm:$0x1]  ;;  %v942_v33 = vrot.slane %v938_v27, %v2618_v31 }
 0x1d9   : > { %v811_v36 = vpop.f32.mrb[2].mxu0 }
 0x1da   : > { %v814_v37 = vpack.c.bf16 %v809_v34, %v809_v34  ;;  %v1628_v38 = vpop.f32.mrb[3].mxu0  ;;  %v1076_v34 = vunpack.c.l.bf16 %v1075_v29  ;;  %v689_v36 = vstv %s688_s25 }
 0x1db   : > { %vm690_vm2 = vcmp.lt.s32.totalorder %v2612_v28, %v689_v36 }
 0x1dc   : > { %1646 = vmatmul.mubr.bf16.vlgmr.msra.gmra.mrb[0].mxu1 %v814_v37  ;;  %v701_v37 = vld [vmem:[%s2803_s18] sm:$0xf]  ;;  %s2072_s18 = sshll.u32 %s2178_s28, 4  ;;  %s2073_s18 = int_to_ptr.vmem [resolvable:$false] %s2072_s18 }
 0x1dd   : > { %1685 = vmatprep.mubr.msk.bf16.mxu1 %vm2177_vm0, %v2176_v0  ;;  %1670 = vmatpush3.bf16.msra.mxu1 %v1853_v4  ;;  %v702_v43 = vunpack.c.l.bf16 %v701_v37  ;;  %s2074_s21 = scalar_lea.vmem %s2073_s18, 128  ;;  %p2075_p12 = scmp.lt.s32.totalorder %s2692_s14, %s2073_s18 }
 0x1de   : > { %1671 = vmatprep.subr.bf16.mxu1 %v2176_v0  ;;  %p2076_p3 = scmp.lt.s32.totalorder %s2074_s21, %s2068_s2 }
 0x1e0   : > { %p2077_p2 = por %p2076_p3, %p2075_p12 }
 0x1e1   : > { %1672 = vmatpush3.bf16.msra.mxu1 %v1855_v6 }
 0x1e2   : > { %1673 = vmatprep.subr.bf16.mxu1 %v2176_v0  ;;  %p2078_p11 = pnand %p2077_p2, %p2071_p10 }
 0x1e5   : > { %1674 = vmatpush3.bf16.msra.mxu1 %v1857_v8 }
 0x1e6   : > { %1675 = vmatprep.subr.bf16.mxu1 %v2176_v0 }
 0x1e9   : > { %1676 = vmatpush3.bf16.msra.mxu1 %v1859_v10 }
 0x1ea   : > { %1677 = vmatprep.subr.bf16.mxu1 %v2176_v0 }
 0x1ed   : > { %1678 = vmatpush3.bf16.msra.mxu1 %v1861_v12 }
 0x1ee   : > { %1679 = vmatprep.subr.bf16.mxu1 %v2176_v0 }
 0x1f1   : > { %1680 = vmatpush3.bf16.msra.mxu1 %v1863_v14 }
 0x1f2   : > { %1681 = vmatprep.subr.bf16.mxu1 %v2176_v0 }
 0x1f5   : > { %1682 = vmatpush3.bf16.msra.mxu1 %v1865_v16 }
 0x1f6   : > { %1683 = vmatprep.subr.bf16.mxu1 %v2176_v0 }
 0x1f7   : > { %v1057_v39 = vpop.f32.mrb[4].mxu0 }
 0x1f8   : > { %v1667_v40 = vpop.f32.mrb[5].mxu0  ;;  %v1058_v53 = vadd.f32 %v1057_v39, %v974_v48  ;;  %v949_v39 = vrot.slane %v945_v30, %v2618_v31 }
 0x1f9   : > { %v1060_v41 = vpop.f32.mrb[6].mxu0  ;;  %1684 = vmatpush3.bf16.msra.mxu1 %v1867_v18  ;;  %v1083_v40 = vunpack.c.l.bf16 %v1082_v32 }
 0x1fa   : > { %v1668_v42 = vpop.f32.mrb[7].mxu0 }
 0x1fb   : > { %v1080_v42 = vrot.slane %v1076_v34, %v2618_v31  ;;  %v1087_v48 = vrot.slane %v1083_v40, %v2618_v31 }
 0x2af   : > { %v919_v49 = vpop.f32.mrb[0].mxu1 }
 0x2b0   : > { %v920_v50 = vadd.f32 %v919_v49, %v836_v47  ;;  %v1647_v51 = vpop.f32.mrb[1].mxu1  ;;  %v1517_v49 = vsel %vm690_vm2, 1.0, %v2176_v0 }
 0x2b1   : > { %v922_v52 = vpop.f32.mrb[2].mxu1 }
 0x2b2   : > { %925 = vadd.xlane.f32.xlu0 %v920_v50  ;;  %v1648_v54 = vpop.f32.mrb[3].mxu1 }
 0x2b3   : > { %v1518_v54 = vsel %vm695_vm3, 1.0, %v2176_v0 }
 0x2b6   : > { %1063 = vadd.xlane.f32.xlu0 %v1058_v53 }
 0x33f   : > { %v926_v57 = vpop.xlane.xlu0 %925 }
 0x340   : > { %v927_v58 = vmul.f32 0.03125, %v926_v57 }
 0x342   : > { %v928_v59 = vsub.f32 %v920_v50, %v927_v58 }
 0x343   : > { %v1064_v60 = vpop.xlane.xlu0 %1063 }
 0x344   : > { %v1065_v61 = vmul.f32 0.03125, %v1064_v60  ;;  %v2632_v62 = vsel %vm700_vm1, %v928_v59, 0.0  ;;  %v1302_v59 = vld [vmem:[%s2804_s0] sm:$0x1] }
 0x345   : > { %v930_v63 = vmul.f32 %v2632_v62, %v2632_v62  ;;  %v1303_v60 = vunpack.c.l.bf16 %v1302_v59 }
 0x346   : > { %v1066_v1 = vsub.f32 %v1058_v53, %v1065_v61 }
 0x347   : > { %931 = vadd.xlane.f32.xlu1 %v930_v63  ;;  %v1307_v28 = vrot.slane %v1303_v60, %v2618_v31 }
 0x348   : > { %v2636_v2 = vsel %vm700_vm1, %v1066_v1, 0.0 }
 0x349   : > { %v1068_v3 = vmul.f32 %v2636_v2, %v2636_v2 }
 0x34b   : > { %1069 = vadd.xlane.f32.xlu1 %v1068_v3 }
 0x3d4   : > { %v932_v19 = vpop.xlane.xlu1 %931 }
 0x3d5   : > { %v933_v20 = vmul.f32 0.03125, %v932_v19 }
 0x3d7   : > { %v934_v21 = vadd.f32 1e-05, %v933_v20 }
 0x3d8   : > { %v1070_v22 = vpop.xlane.xlu1 %1069 }
 0x3d9   : > { %1868 = vrsqrt.f32 %v934_v21  ;;  %v1071_v23 = vmul.f32 0.03125, %v1070_v22 }
 0x3db   : > { %v1072_v25 = vadd.f32 1e-05, %v1071_v23 }
 0x3dd   : > { %1870 = vrsqrt.f32 %v1072_v25 }
 0x3e3   : > { %v1869_v35 = vpop.eup %1868 }
 0x3e4   : > { %v936_v38 = vmul.f32 %v1869_v35, %v2632_v62 }
 0x3e6   : > { %v943_v41 = vmul.f32 %v942_v33, %v936_v38 }
 0x3e7   : > { %v1871_v44 = vpop.eup %1870 }
 0x3e8   : > { %v1074_v46 = vmul.f32 %v1871_v44, %v2636_v2  ;;  %v950_v47 = vadd.f32 %v949_v39, %v943_v41 }
 0x3ea   : > { %v1081_v50 = vmul.f32 %v1080_v42, %v1074_v46  ;;  %v951_v51 = vadd.f32 %v950_v47, %v702_v43 }
 0x3ec   : > { %v1090_v52 = vmul.f32 %v1517_v49, %v951_v51  ;;  %v1088_v53 = vadd.f32 %v1087_v48, %v1081_v50 }
 0x3ee   : > { %v1092_v55 = vpack.c.bf16 %v1090_v52, %v1090_v52  ;;  %v1089_v56 = vadd.f32 %v1088_v53, %v702_v43 }
 0x3f0   : > { %1706 = vmatmul.mubr.bf16.vlgmr.msra.gmra.mrb[8].mxu0 %v1092_v55  ;;  %v1091_v57 = vmul.f32 %v1518_v54, %v1089_v56 }
 0x3f2   : > { %v1109_v58 = vpack.c.bf16 %v1091_v57, %v1091_v57 }
 0x3f4   : > { %1686 = vmatmul.mubr.bf16.vlgmr.msra.gmra.mrb[4].mxu1 %v1109_v58 }
 0x4c3   : > { %v1296_v61 = vpop.f32.mrb[8].mxu0 }
 0x4c4   : > { %v1707_v62 = vpop.f32.mrb[9].mxu0 }
 0x4c5   : > { %v1299_v63 = vpop.f32.mrb[10].mxu0 }
 0x4c6   : > { %v1708_v1 = vpop.f32.mrb[11].mxu0 }
 0x4c7   : > { %v1208_v2 = vpop.f32.mrb[4].mxu1 }
 0x4c8   : > { %v1297_v3 = vadd.f32 %v1296_v61, %v1208_v2  ;;  %v1687_v0 = vpop.f32.mrb[5].mxu1 }
 0x4c9   : > { %v1211_v4 = vpop.f32.mrb[6].mxu1 }
 0x4ca   : > { %v1308_v5 = vadd.f32 %v1307_v28, %v1297_v3  ;;  %v1688_v6 = vpop.f32.mrb[7].mxu1 }
 0x4cc   : > { %v1559_v7 = vmul.f32 -1.442695, %v1308_v5 }
 0x4ce   : > { %1872 = vpow2.f32 %v1559_v7 }
 0x4d8   : > { %v1873_v8 = vpop.eup %1872 }
 0x4d9   : > { %v1312_v9 = vadd.f32 1.0, %v1873_v8 }
 0x4db   : > { %1874 = vrcp.f32 %v1312_v9 }
 0x4e5   : > { %v1875_v10 = vpop.eup %1874 }
 0x4e6   : > { %v1316_v11 = vsub.f32 1.0, %v1875_v10  ;;  %v1315_v12 = vmul.f32 %v1875_v10, %v1090_v52 }
 0x4e8   : > { %v1317_v13 = vmul.f32 %v1316_v11, %v1091_v57 }
 0x4ea   : > { %v1318_v31 = vadd.f32 %v1317_v13, %v1315_v12 }
 0x4ec   : > { %v1319_v14 = vadd.f32 %v1318_v31, %v951_v51 }
 0x4ee   : > { %v1320_v15 = vadd.f32 %v1319_v14, %v1089_v56 }
 0x4f0   : > { %v1321_v16 = vpack.c.bf16 %v1320_v15, %v1320_v15 }
 0x4f2   : > { %1322 = vst [vmem:[%s670_s3] sm:$0xf] %v1321_v16 }
 0x4f3   : > { %2081 = shalt.err (!%p2078_p11)
}
 0x4f4   : > { %s2082_s7 = scalar_lea.hbm %s2690_s23, 64  ;;  %s2086_s5 = scalar_lea.hbm %s2806_s9, 128 }
 0x4f5   : > { %p2083_p6 = scmp.ne.s32.totalorder %s2690_s23, %s2082_s7  ;;  %p2087_p5 = scmp.lt.u32.totalorder %s2690_s23, %s2806_s9 }
 0x4f6   : > { %p2088_p1 = scmp.lt.u32.totalorder %s2086_s5, %s2082_s7  ;;  %p2090_p13 = scmp.lt.u32.totalorder %s2082_s7, %s2690_s23 }
 0x4f7   : > { %p2084_p7 = pnand %p2083_p6, %p2807_p4 }
 0x4f8   : > { %p2089_p0 = por %p2088_p1, %p2087_p5 }
 0x4f9   : > { %p2085_p8 = pneg %p2084_p7 }
 0x4fa   : > { %p2091_p9 = por %p2090_p13, %p2089_p0 }
 0x4fc   : > { %p2092_p10 = pnand %p2091_p9, %p2085_p8 }
 0x4fe   : > { %2095 = shalt.err (!%p2092_p10)
}
 0x4ff   : > { %1731 = dma.vmem_to_hbm [thread:$0]  (%p2807_p4), %s2692_s14, 64, %s2690_s23, %s1324_s19  }
 0x500 PF: > { %s1350_s24 = sand.u32 1, %s2144_s1   ;;  %p2808_p12 = scmp.ne.s32.totalorder %s2792_s20, 0 }
 0x501   : > { %p2809_p3 = scmp.ge.s32.totalorder %s2164_s30, 2  ;;  %s1351_s17 = scalar_lea.sflag [#allocation7], %s1350_s24 }
 0x503   : > { %p1754_p2 = pnand %p2809_p3, %p2808_p12 }
 0x505   : > { %2139 = dma.done.wait (!%p1754_p2), %s1351_s17, 64  }
 0x506   : > { %2141 = vsyncadd (!%p1754_p2), %s1351_s17, 4294967232  ;;  %s45_s30 = sadd.s32 1, %s2164_s30   ;;  %s2810_s1 = smov %s2148_s26 }
 0x507   : > { %p42_p11 = scmp.ge.s32.totalorder %s45_s30, 4   ;;  %s2811_s26 = smov %s2152_s27 }
 0x508   : > { %s2812_s27 = smov %s2499_s13  ;;  %s2813_s28 = smov %s2160_s29 }
 0x509   : > { %s2814_s29 = smov %s2816_s22  ;;  %44 = sbr.rel (!%p42_p11) target bundleno = 39 (0x27), region = 155 }
 0x510   :  { %1356 = vsyncpa [#allocation6], 1 }
 0x511   :  { %1358 = vsyncpa [#allocation6 + $0x1], 1 }
 0x512   :  { %1359 = vsyncpa [#allocation9], 1 }
 0x513   :  { %1360 = vsyncpa [#allocation12], 1 }
 0x514   :  { %1361 = vsyncpa [#allocation15], 1 }
 0x515   :  { %1362 = vsyncpa [#allocation7], 1 }
 0x516   :  { %1364 = vsyncpa [#allocation7 + $0x1], 1 }

</bundles_post_ra>
